<compile_context>
chip_gen: v7x
topology: tpu7x:2x2x1
jax: 0.10.0
libtpu: 0.0.40
codegen_flags: <defaults>
</compile_context>

<pallas_src>
import functools

import jax
import jax.numpy as jnp
from jax.experimental import pallas as pl
from jax.experimental.pallas import tpu as pltpu


# ----------------------------- configuration ------------------------------ #
SEQ_LEN = 8
BATCH = 8
OBS_DIM = 16
N_AGENTS = 4
OBS_IN = OBS_DIM + N_AGENTS            # obs_fc input dim (20)
OBS_EMB = 32                           # args.observation_embedding_dim
INPUT_SHAPE = 24                       # input_shape (per-agent inputs)
HIDDEN = 32                            # args.hidden_dim
N_ACTIONS = 8                          # args.n_actions
EPS = 1e-8

# packing layout -------------------------------------------------------------
OBS_PAD = ((OBS_IN + 7) // 8) * 8      # obs zero-padded to multiple of 8 (24)
SEQ_F = OBS_PAD + INPUT_SHAPE          # per-step input slab lanes (48)
H_PAD = 128                            # hidden padded to one full vreg of lanes
GATE_LANES = 3 * 128                   # r / z / n each in its own 128-lane block
OUT_LANES = 128                        # merged [h | q | zero-pad] output lanes

# weight-slab row offsets (all multiples of 8 -> sublane-aligned slices)
R_OBS = 0                              # w_obs            (OBS_PAD rows)
R_W1I = R_OBS + OBS_PAD                # w1[:INPUT_SHAPE] (INPUT_SHAPE rows)
R_W1E = R_W1I + INPUT_SHAPE            # w1[INPUT_SHAPE:] (OBS_EMB rows)
R_IH = R_W1E + OBS_EMB                 # w_ih gate-padded (HIDDEN rows)
R_HH = R_IH + HIDDEN                   # w_hh gate-padded (H_PAD rows, top HIDDEN nonzero)
R_OUT = R_HH + H_PAD                   # [I | w2] fused output weight (H_PAD rows)
W_ROWS = R_OUT + H_PAD                 # 368
B_ROWS = 8                             # bias slab rows (one bias per row)


# ------------------------------- the kernel ------------------------------- #
def _task_encoder_kernel(seq_ref, h0_ref, w_ref, b_ref, out_ref, gi_sc, h_sc,
                         *, seq_len, batch):
    f32 = jnp.float32
    tb = seq_len * batch

    seq = seq_ref[...]                                   # (T*B, SEQ_F)
    obs = seq[:, :OBS_PAD]                               # zero-padded observations
    inp = seq[:, OBS_PAD:]                               # per-agent inputs

    # --------- batched phase: all h-independent work for ALL T steps ---------
    # obs_fc + AvgL1Norm (pad rows of w_obs are zero, so obs padding is a no-op)
    emb = (jnp.dot(obs, w_ref[R_OBS:R_OBS + OBS_PAD, :OBS_EMB],
                   preferred_element_type=f32) + b_ref[0:1, :OBS_EMB])
    denom = jnp.maximum(jnp.mean(jnp.abs(emb), axis=-1, keepdims=True), EPS)
    emb = emb / denom          # exact divide: off the serial path, keeps test atol

    # fc1 + ReLU as two accumulated matmuls (no lane concat)
    x = jnp.dot(inp, w_ref[R_W1I:R_W1I + INPUT_SHAPE, :HIDDEN],
                preferred_element_type=f32)
    x = x + jnp.dot(emb, w_ref[R_W1E:R_W1E + OBS_EMB, :HIDDEN],
                    preferred_element_type=f32)
    x = jnp.maximum(x + b_ref[1:2, :HIDDEN], 0.0)

    # gi = x @ w_ih + b_ih for all steps, gate-padded to 128-lane blocks
    gi_all = (jnp.dot(x, w_ref[R_IH:R_IH + HIDDEN, :],
                      preferred_element_type=f32) + b_ref[2:3, :])
    gi_sc[...] = gi_all.reshape(seq_len, batch, GATE_LANES)

    # --------- serial recurrence: only gh matmul + gate math per step --------
    w_hh = w_ref[R_HH:R_HH + H_PAD, :]                   # (128, 384), rows>=32 zero
    b_hh = b_ref[3:4, :]                                 # (1, 384)

    def step(t, h):                                      # h: (B, 128), lanes>=32 zero
        gi = gi_sc[t]                                    # (B, 384)
        gh = jnp.dot(h, w_hh, preferred_element_type=f32) + b_hh
        # PyTorch GRUCell: gate order r, z, n; b_hh_n stays inside r*(.)
        r = jax.nn.sigmoid(gi[:, 0:128] + gh[:, 0:128])
        z = jax.nn.sigmoid(gi[:, 128:256] + gh[:, 128:256])
        n = jnp.tanh(gi[:, 256:384] + r * gh[:, 256:384])
        h_new = (1.0 - z) * n + z * h                    # junk lanes stay exactly 0
        h_sc[t] = h_new                                  # lane-dense (B, 128) store
        return h_new

    jax.lax.fori_loop(0, seq_len, step, h0_ref[...], unroll=True)

    # --------- batched output: one fused [I | w2] matmul, one dense store ----
    h_all = h_sc[...].reshape(tb, H_PAD)
    out_ref[...] = (jnp.dot(h_all, w_ref[R_OUT:R_OUT + H_PAD, :OUT_LANES],
                            preferred_element_type=f32) + b_ref[4:5, :OUT_LANES])


# ------------------------------ python wrapper ----------------------------- #
@jax.jit
def task_encoder_rnn_forward_seq(observations, inputs, hidden_state, wslab, bslab):
    """Runs T timesteps in ONE kernel invocation.

    observations: (T, B, OBS_IN)   inputs: (T, B, INPUT_SHAPE)
    hidden_state: anything reshapeable to (B, HIDDEN)
    Returns (q_seq, h_seq, None) with shapes (T, B, N_ACTIONS), (T, B, HIDDEN).
    """
    T, B = observations.shape[0], observations.shape[1]
    h0 = hidden_state.reshape(-1, HIDDEN).astype(jnp.float32)
    h0_p = jnp.pad(h0, ((0, 0), (0, H_PAD - HIDDEN)))            # (B, 128)

    # Pack per-step inputs into one slab: [obs | zero-pad | inputs], flat T*B rows.
    obs_p = jnp.pad(observations, ((0, 0), (0, 0), (0, OBS_PAD - OBS_IN)))
    seq = jnp.concatenate([obs_p, inputs], axis=-1).reshape(T * B, SEQ_F)

    kernel = functools.partial(_task_encoder_kernel, seq_len=T, batch=B)

    out = pl.pallas_call(
        kernel,
        out_shape=jax.ShapeDtypeStruct((T * B, OUT_LANES), jnp.float32),
        grid_spec=pltpu.PrefetchScalarGridSpec(
            num_scalar_prefetch=0,
            grid=(1,),                                            # single invocation
            in_specs=[
                pl.BlockSpec((T * B, SEQ_F), lambda i: (0, 0)),   # all-step inputs
                pl.BlockSpec((B, H_PAD), lambda i: (0, 0)),       # padded h0
                pl.BlockSpec((W_ROWS, GATE_LANES), lambda i: (0, 0)),  # weight slab
                pl.BlockSpec((B_ROWS, GATE_LANES), lambda i: (0, 0)),  # bias slab
            ],
            out_specs=pl.BlockSpec((T * B, OUT_LANES), lambda i: (0, 0)),
            scratch_shapes=[
                pltpu.VMEM((T, B, GATE_LANES), jnp.float32),      # gi for all steps
                pltpu.VMEM((T, B, H_PAD), jnp.float32),           # h for all steps
            ],
        ),
        compiler_params=pltpu.CompilerParams(
            dimension_semantics=("arbitrary",),
        ),
    )(seq, h0_p, wslab, bslab)

    out = out.reshape(T, B, OUT_LANES)
    h_seq = out[..., :HIDDEN]
    q_seq = out[..., HIDDEN:HIDDEN + N_ACTIONS]
    return q_seq, h_seq, None


def task_encoder_rnn_forward(observations, inputs, hidden_state, wslab, bslab):
    """Single-step forward matching the PyTorch module: returns (q, h, None)."""
    q_seq, h_seq, _ = task_encoder_rnn_forward_seq(
        observations[None], inputs[None], hidden_state, wslab, bslab)
    return q_seq[0], h_seq[0], None


# --------------------------- deterministic params --------------------------- #
def init_params(key):
    ks = jax.random.split(key, 8)

    def lin(k, fan_in, fan_out):
        bound = 1.0 / jnp.sqrt(jnp.float32(fan_in))
        kw, kb = jax.random.split(k)
        w = jax.random.uniform(kw, (fan_in, fan_out), jnp.float32, -bound, bound)
        b = jax.random.uniform(kb, (fan_out,), jnp.float32, -bound, bound)
        return w, b

    w_obs, b_obs = lin(ks[0], OBS_IN, OBS_EMB)
    w1, b1 = lin(ks[1], INPUT_SHAPE + OBS_EMB, HIDDEN)
    bound = 1.0 / jnp.sqrt(jnp.float32(HIDDEN))
    w_ih = jax.random.uniform(ks[2], (HIDDEN, 3 * HIDDEN), jnp.float32, -bound, bound)
    w_hh = jax.random.uniform(ks[3], (HIDDEN, 3 * HIDDEN), jnp.float32, -bound, bound)
    b_ih = jax.random.uniform(ks[4], (3 * HIDDEN,), jnp.float32, -bound, bound)
    b_hh = jax.random.uniform(ks[5], (3 * HIDDEN,), jnp.float32, -bound, bound)
    w2, b2 = lin(ks[6], HIDDEN, N_ACTIONS)

    return dict(w_obs=w_obs, b_obs=b_obs, w1=w1, b1=b1,
                w_ih=w_ih, b_ih=b_ih, w_hh=w_hh, b_hh=b_hh, w2=w2, b2=b2)


def pack_params(p):
    """Pack all weights/biases into two lane-dense VMEM-resident slabs (once)."""
    w = jnp.zeros((W_ROWS, GATE_LANES), jnp.float32)
    w = w.at[R_OBS:R_OBS + OBS_IN, :OBS_EMB].set(p["w_obs"])
    w = w.at[R_W1I:R_W1I + INPUT_SHAPE, :HIDDEN].set(p["w1"][:INPUT_SHAPE, :])
    w = w.at[R_W1E:R_W1E + OBS_EMB, :HIDDEN].set(p["w1"][INPUT_SHAPE:, :])
    for g in range(3):  # gate g (r, z, n) lives at lanes [g*128 : g*128+HIDDEN]
        w = w.at[R_IH:R_IH + HIDDEN, g * 128:g * 128 + HIDDEN].set(
            p["w_ih"][:, g * HIDDEN:(g + 1) * HIDDEN])
        w = w.at[R_HH:R_HH + HIDDEN, g * 128:g * 128 + HIDDEN].set(
            p["w_hh"][:, g * HIDDEN:(g + 1) * HIDDEN])
    # fused output weight: [h passthrough identity | w2]
    w = w.at[R_OUT:R_OUT + HIDDEN, :HIDDEN].set(jnp.eye(HIDDEN, dtype=jnp.float32))
    w = w.at[R_OUT:R_OUT + HIDDEN, HIDDEN:HIDDEN + N_ACTIONS].set(p["w2"])

    b = jnp.zeros((B_ROWS, GATE_LANES), jnp.float32)
    b = b.at[0, :OBS_EMB].set(p["b_obs"])
    b = b.at[1, :HIDDEN].set(p["b1"])
    for g in range(3):
        b = b.at[2, g * 128:g * 128 + HIDDEN].set(p["b_ih"][g * HIDDEN:(g + 1) * HIDDEN])
        b = b.at[3, g * 128:g * 128 + HIDDEN].set(p["b_hh"][g * HIDDEN:(g + 1) * HIDDEN])
    b = b.at[4, HIDDEN:HIDDEN + N_ACTIONS].set(p["b2"])
    return w, b


# --------------------------- pure-JAX reference ----------------------------- #
def reference_forward_step(observations, inputs, h_in, p):
    emb = observations @ p["w_obs"] + p["b_obs"]
    emb = emb / jnp.maximum(jnp.mean(jnp.abs(emb), axis=-1, keepdims=True), EPS)
    aug = jnp.concatenate([inputs, emb], axis=1)
    x = jax.nn.relu(aug @ p["w1"] + p["b1"])
    gi = x @ p["w_ih"] + p["b_ih"]
    gh = h_in @ p["w_hh"] + p["b_hh"]
    H = HIDDEN
    r = jax.nn.sigmoid(gi[:, :H] + gh[:, :H])
    z = jax.nn.sigmoid(gi[:, H:2 * H] + gh[:, H:2 * H])
    n = jnp.tanh(gi[:, 2 * H:] + r * gh[:, 2 * H:])
    h = (1.0 - z) * n + z * h_in
    q = h @ p["w2"] + p["b2"]
    return q, h


def reference_forward_seq(observations, inputs, hidden_state, p):
    h0 = hidden_state.reshape(-1, HIDDEN)

    def step(h, xs):
        obs, inp = xs
        q, h_new = reference_forward_step(obs, inp, h, p)
        return h_new, (q, h_new)

    _, (q_seq, h_seq) = jax.lax.scan(step, h0, (observations, inputs))
    return q_seq, h_seq, None


# ---------------------------------- main ----------------------------------- #
if __name__ == "__main__":
    key = jax.random.PRNGKey(0)
    k_obs, k_inp, k_h, k_par = jax.random.split(key, 4)

    observations = jax.random.normal(k_obs, (SEQ_LEN, BATCH, OBS_IN), jnp.float32)
    inputs = jax.random.normal(k_inp, (SEQ_LEN, BATCH, INPUT_SHAPE), jnp.float32)
    hidden_state = jax.random.normal(k_h, (BATCH, HIDDEN), jnp.float32)

    params = init_params(k_par)
    wslab, bslab = pack_params(params)

    # full-sequence fused call (one kernel invocation for all T steps)
    q_seq, h_seq, _ = task_encoder_rnn_forward_seq(
        observations, inputs, hidden_state, wslab, bslab)
    q_seq = jax.block_until_ready(q_seq)
    h_seq = jax.block_until_ready(h_seq)

    q_ref, h_ref, _ = reference_forward_seq(observations, inputs, hidden_state, params)
    assert q_seq.shape == (SEQ_LEN, BATCH, N_ACTIONS)
    assert h_seq.shape == (SEQ_LEN, BATCH, HIDDEN)
    assert jnp.allclose(q_seq, q_ref, atol=1e-4, rtol=1e-5)
    assert jnp.allclose(h_seq, h_ref, atol=1e-4, rtol=1e-5)

    # single-step API matching the PyTorch module's forward signature
    q1, h1, _ = task_encoder_rnn_forward(
        observations[0], inputs[0], hidden_state, wslab, bslab)
    q1 = jax.block_until_ready(q1)
    h1 = jax.block_until_ready(h1)
    assert jnp.allclose(q1, q_ref[0], atol=1e-4, rtol=1e-5)
    assert jnp.allclose(h1, h_ref[0], atol=1e-4, rtol=1e-5)

    print("KERNEL_OK")
</pallas_src>

<mosaic_0001>
module attributes {stable_mosaic.version = 11 : i64} {
  func.func @_task_encoder_kernel(%arg0: i32, %arg1: memref<64x48xf32, #tpu.memory_space<vmem>>, %arg2: memref<8x128xf32, #tpu.memory_space<vmem>>, %arg3: memref<368x384xf32, #tpu.memory_space<vmem>>, %arg4: memref<8x384xf32, #tpu.memory_space<vmem>>, %arg5: memref<64x128xf32, #tpu.memory_space<vmem>>, %arg6: memref<8x8x384xf32, #tpu.memory_space<vmem>>, %arg7: memref<8x8x128xf32, #tpu.memory_space<vmem>>) attributes {dimension_semantics = [#tpu.dimension_semantics<arbitrary>], iteration_bounds = array<i64: 1>, scalar_prefetch = 0 : i64, scratch_operands = 2 : i64, tpu.core_type = #tpu.core_type<tc>, window_params = [{pipeline_mode = #tpu.pipeline_mode<synchronous>, transform_indices = @transform_0, window_bounds = array<i64: 64, 48>}, {pipeline_mode = #tpu.pipeline_mode<synchronous>, transform_indices = @transform_1, window_bounds = array<i64: 8, 128>}, {pipeline_mode = #tpu.pipeline_mode<synchronous>, transform_indices = @transform_2, window_bounds = array<i64: 368, 384>}, {pipeline_mode = #tpu.pipeline_mode<synchronous>, transform_indices = @transform_3, window_bounds = array<i64: 8, 384>}, {pipeline_mode = #tpu.pipeline_mode<synchronous>, transform_indices = @transform_4, window_bounds = array<i64: 64, 128>}]} {
    %c0 = arith.constant 0 : index
    %c0_0 = arith.constant 0 : index
    %0 = vector.load %arg1[%c0, %c0_0] : memref<64x48xf32, #tpu.memory_space<vmem>>, vector<64x48xf32>
    %1 = vector.extract_strided_slice %0 {offsets = [0, 0], sizes = [64, 24], strides = [1, 1]} : vector<64x48xf32> to vector<64x24xf32>
    %2 = vector.extract_strided_slice %0 {offsets = [0, 24], sizes = [64, 24], strides = [1, 1]} : vector<64x48xf32> to vector<64x24xf32>
    %c0_1 = arith.constant 0 : index
    %c0_2 = arith.constant 0 : index
    %3 = vector.load %arg3[%c0_1, %c0_2] : memref<368x384xf32, #tpu.memory_space<vmem>>, vector<24x32xf32>
    %cst = arith.constant dense<0.000000e+00> : vector<64x32xf32>
    %4 = tpu.matmul %1, %3, %cst {dimension_numbers = #tpu.dot_dimension_numbers<[1], [0], [0], [1], [0, 0, 1, 1], [], []>} : vector<64x24xf32>, vector<24x32xf32>, vector<64x32xf32> -> vector<64x32xf32>
    %c0_3 = arith.constant 0 : index
    %c0_4 = arith.constant 0 : index
    %5 = vector.load %arg4[%c0_3, %c0_4] : memref<8x384xf32, #tpu.memory_space<vmem>>, vector<1x32xf32>
    %6 = vector.broadcast %5 : vector<1x32xf32> to vector<64x32xf32>
    %7 = arith.addf %4, %6 : vector<64x32xf32>
    %8 = math.absf %7 : vector<64x32xf32>
    %cst_5 = arith.constant dense<0.000000e+00> : vector<64xf32>
    %9 = vector.multi_reduction <add>, %8, %cst_5 [1] : vector<64x32xf32> to vector<64xf32>
    %10 = vector.shape_cast %9 : vector<64xf32> to vector<64x1xf32>
    %cst_6 = arith.constant 3.200000e+01 : f32
    %11 = vector.broadcast %cst_6 : f32 to vector<64x1xf32>
    %12 = arith.divf %10, %11 : vector<64x1xf32>
    %cst_7 = arith.constant 9.99999993E-9 : f32
    %13 = vector.broadcast %cst_7 : f32 to vector<64x1xf32>
    %14 = arith.maximumf %12, %13 : vector<64x1xf32>
    %15 = vector.broadcast %14 : vector<64x1xf32> to vector<64x32xf32>
    %16 = arith.divf %7, %15 : vector<64x32xf32>
    %c24 = arith.constant 24 : index
    %c0_8 = arith.constant 0 : index
    %17 = vector.load %arg3[%c24, %c0_8] : memref<368x384xf32, #tpu.memory_space<vmem>>, vector<24x32xf32>
    %cst_9 = arith.constant dense<0.000000e+00> : vector<64x32xf32>
    %18 = tpu.matmul %2, %17, %cst_9 {dimension_numbers = #tpu.dot_dimension_numbers<[1], [0], [0], [1], [0, 0, 1, 1], [], []>} : vector<64x24xf32>, vector<24x32xf32>, vector<64x32xf32> -> vector<64x32xf32>
    %c48 = arith.constant 48 : index
    %c0_10 = arith.constant 0 : index
    %19 = vector.load %arg3[%c48, %c0_10] : memref<368x384xf32, #tpu.memory_space<vmem>>, vector<32x32xf32>
    %cst_11 = arith.constant dense<0.000000e+00> : vector<64x32xf32>
    %20 = tpu.matmul %16, %19, %cst_11 {dimension_numbers = #tpu.dot_dimension_numbers<[1], [0], [0], [1], [0, 0, 1, 1], [], []>} : vector<64x32xf32>, vector<32x32xf32>, vector<64x32xf32> -> vector<64x32xf32>
    %21 = arith.addf %18, %20 : vector<64x32xf32>
    %c1 = arith.constant 1 : index
    %c0_12 = arith.constant 0 : index
    %22 = vector.load %arg4[%c1, %c0_12] : memref<8x384xf32, #tpu.memory_space<vmem>>, vector<1x32xf32>
    %23 = vector.broadcast %22 : vector<1x32xf32> to vector<64x32xf32>
    %24 = arith.addf %21, %23 : vector<64x32xf32>
    %cst_13 = arith.constant 0.000000e+00 : f32
    %25 = vector.broadcast %cst_13 : f32 to vector<64x32xf32>
    %26 = arith.maximumf %24, %25 : vector<64x32xf32>
    %c80 = arith.constant 80 : index
    %c0_14 = arith.constant 0 : index
    %27 = vector.load %arg3[%c80, %c0_14] : memref<368x384xf32, #tpu.memory_space<vmem>>, vector<32x384xf32>
    %cst_15 = arith.constant dense<0.000000e+00> : vector<64x384xf32>
    %28 = tpu.matmul %26, %27, %cst_15 {dimension_numbers = #tpu.dot_dimension_numbers<[1], [0], [0], [1], [0, 0, 1, 1], [], []>} : vector<64x32xf32>, vector<32x384xf32>, vector<64x384xf32> -> vector<64x384xf32>
    %c2 = arith.constant 2 : index
    %c0_16 = arith.constant 0 : index
    %29 = vector.load %arg4[%c2, %c0_16] : memref<8x384xf32, #tpu.memory_space<vmem>>, vector<1x384xf32>
    %30 = vector.broadcast %29 : vector<1x384xf32> to vector<64x384xf32>
    %31 = arith.addf %28, %30 : vector<64x384xf32>
    %32 = vector.shape_cast %31 : vector<64x384xf32> to vector<8x8x384xf32>
    %c0_17 = arith.constant 0 : index
    %c0_18 = arith.constant 0 : index
    %c0_19 = arith.constant 0 : index
    %33 = vector.load %arg6[%c0_17, %c0_18, %c0_19] : memref<8x8x384xf32, #tpu.memory_space<vmem>>, vector<8x8x384xf32>
    tpu.vector_store %arg6[%c0_17, %c0_18, %c0_19], %32 {strides = array<i32>} : memref<8x8x384xf32, #tpu.memory_space<vmem>>, vector<8x8x384xf32>,
    %c112 = arith.constant 112 : index
    %c0_20 = arith.constant 0 : index
    %34 = vector.load %arg3[%c112, %c0_20] : memref<368x384xf32, #tpu.memory_space<vmem>>, vector<128x384xf32>
    %c3 = arith.constant 3 : index
    %c0_21 = arith.constant 0 : index
    %35 = vector.load %arg4[%c3, %c0_21] : memref<8x384xf32, #tpu.memory_space<vmem>>, vector<1x384xf32>
    %c0_22 = arith.constant 0 : index
    %c0_23 = arith.constant 0 : index
    %36 = vector.load %arg2[%c0_22, %c0_23] : memref<8x128xf32, #tpu.memory_space<vmem>>, vector<8x128xf32>
    %c0_i32 = arith.constant 0 : i32
    %37 = arith.index_cast %c0_i32 : i32 to index
    %c0_24 = arith.constant 0 : index
    %c0_25 = arith.constant 0 : index
    %38 = vector.load %arg6[%37, %c0_24, %c0_25] : memref<8x8x384xf32, #tpu.memory_space<vmem>>, vector<1x8x384xf32>
    %39 = vector.shape_cast %38 : vector<1x8x384xf32> to vector<8x384xf32>
    %cst_26 = arith.constant dense<0.000000e+00> : vector<8x384xf32>
    %40 = tpu.matmul %36, %34, %cst_26 {dimension_numbers = #tpu.dot_dimension_numbers<[1], [0], [0], [1], [0, 0, 1, 1], [], []>} : vector<8x128xf32>, vector<128x384xf32>, vector<8x384xf32> -> vector<8x384xf32>
    %41 = vector.broadcast %35 : vector<1x384xf32> to vector<8x384xf32>
    %42 = arith.addf %40, %41 : vector<8x384xf32>
    %43 = vector.extract_strided_slice %39 {offsets = [0, 0], sizes = [8, 128], strides = [1, 1]} : vector<8x384xf32> to vector<8x128xf32>
    %44 = vector.extract_strided_slice %42 {offsets = [0, 0], sizes = [8, 128], strides = [1, 1]} : vector<8x384xf32> to vector<8x128xf32>
    %45 = arith.addf %43, %44 : vector<8x128xf32>
    %46 = arith.negf %45 : vector<8x128xf32>
    %47 = math.exp %46 : vector<8x128xf32>
    %cst_27 = arith.constant 1.000000e+00 : f32
    %48 = vector.broadcast %cst_27 : f32 to vector<8x128xf32>
    %49 = arith.addf %48, %47 : vector<8x128xf32>
    %50 = arith.divf %48, %49 : vector<8x128xf32>
    %51 = vector.extract_strided_slice %39 {offsets = [0, 128], sizes = [8, 128], strides = [1, 1]} : vector<8x384xf32> to vector<8x128xf32>
    %52 = vector.extract_strided_slice %42 {offsets = [0, 128], sizes = [8, 128], strides = [1, 1]} : vector<8x384xf32> to vector<8x128xf32>
    %53 = arith.addf %51, %52 : vector<8x128xf32>
    %54 = arith.negf %53 : vector<8x128xf32>
    %55 = math.exp %54 : vector<8x128xf32>
    %cst_28 = arith.constant 1.000000e+00 : f32
    %56 = vector.broadcast %cst_28 : f32 to vector<8x128xf32>
    %57 = arith.addf %56, %55 : vector<8x128xf32>
    %58 = arith.divf %56, %57 : vector<8x128xf32>
    %59 = vector.extract_strided_slice %39 {offsets = [0, 256], sizes = [8, 128], strides = [1, 1]} : vector<8x384xf32> to vector<8x128xf32>
    %60 = vector.extract_strided_slice %42 {offsets = [0, 256], sizes = [8, 128], strides = [1, 1]} : vector<8x384xf32> to vector<8x128xf32>
    %61 = arith.mulf %50, %60 : vector<8x128xf32>
    %62 = arith.addf %59, %61 : vector<8x128xf32>
    %63 = math.tanh %62 : vector<8x128xf32>
    %cst_29 = arith.constant 1.000000e+00 : f32
    %64 = vector.broadcast %cst_29 : f32 to vector<8x128xf32>
    %65 = arith.subf %64, %58 : vector<8x128xf32>
    %66 = arith.mulf %65, %63 : vector<8x128xf32>
    %67 = arith.mulf %58, %36 : vector<8x128xf32>
    %68 = arith.addf %66, %67 : vector<8x128xf32>
    %69 = arith.index_cast %c0_i32 : i32 to index
    %c0_30 = arith.constant 0 : index
    %c0_31 = arith.constant 0 : index
    %70 = vector.load %arg7[%69, %c0_30, %c0_31] : memref<8x8x128xf32, #tpu.memory_space<vmem>>, vector<1x8x128xf32>
    %71 = vector.shape_cast %70 : vector<1x8x128xf32> to vector<8x128xf32>
    %72 = vector.shape_cast %68 : vector<8x128xf32> to vector<1x8x128xf32>
    tpu.vector_store %arg7[%69, %c0_30, %c0_31], %72 {strides = array<i32>} : memref<8x8x128xf32, #tpu.memory_space<vmem>>, vector<1x8x128xf32>,
    %c1_i32 = arith.constant 1 : i32
    %73 = arith.index_cast %c1_i32 : i32 to index
    %c0_32 = arith.constant 0 : index
    %c0_33 = arith.constant 0 : index
    %74 = vector.load %arg6[%73, %c0_32, %c0_33] : memref<8x8x384xf32, #tpu.memory_space<vmem>>, vector<1x8x384xf32>
    %75 = vector.shape_cast %74 : vector<1x8x384xf32> to vector<8x384xf32>
    %cst_34 = arith.constant dense<0.000000e+00> : vector<8x384xf32>
    %76 = tpu.matmul %68, %34, %cst_34 {dimension_numbers = #tpu.dot_dimension_numbers<[1], [0], [0], [1], [0, 0, 1, 1], [], []>} : vector<8x128xf32>, vector<128x384xf32>, vector<8x384xf32> -> vector<8x384xf32>
    %77 = vector.broadcast %35 : vector<1x384xf32> to vector<8x384xf32>
    %78 = arith.addf %76, %77 : vector<8x384xf32>
    %79 = vector.extract_strided_slice %75 {offsets = [0, 0], sizes = [8, 128], strides = [1, 1]} : vector<8x384xf32> to vector<8x128xf32>
    %80 = vector.extract_strided_slice %78 {offsets = [0, 0], sizes = [8, 128], strides = [1, 1]} : vector<8x384xf32> to vector<8x128xf32>
    %81 = arith.addf %79, %80 : vector<8x128xf32>
    %82 = arith.negf %81 : vector<8x128xf32>
    %83 = math.exp %82 : vector<8x128xf32>
    %cst_35 = arith.constant 1.000000e+00 : f32
    %84 = vector.broadcast %cst_35 : f32 to vector<8x128xf32>
    %85 = arith.addf %84, %83 : vector<8x128xf32>
    %86 = arith.divf %84, %85 : vector<8x128xf32>
    %87 = vector.extract_strided_slice %75 {offsets = [0, 128], sizes = [8, 128], strides = [1, 1]} : vector<8x384xf32> to vector<8x128xf32>
    %88 = vector.extract_strided_slice %78 {offsets = [0, 128], sizes = [8, 128], strides = [1, 1]} : vector<8x384xf32> to vector<8x128xf32>
    %89 = arith.addf %87, %88 : vector<8x128xf32>
    %90 = arith.negf %89 : vector<8x128xf32>
    %91 = math.exp %90 : vector<8x128xf32>
    %cst_36 = arith.constant 1.000000e+00 : f32
    %92 = vector.broadcast %cst_36 : f32 to vector<8x128xf32>
    %93 = arith.addf %92, %91 : vector<8x128xf32>
    %94 = arith.divf %92, %93 : vector<8x128xf32>
    %95 = vector.extract_strided_slice %75 {offsets = [0, 256], sizes = [8, 128], strides = [1, 1]} : vector<8x384xf32> to vector<8x128xf32>
    %96 = vector.extract_strided_slice %78 {offsets = [0, 256], sizes = [8, 128], strides = [1, 1]} : vector<8x384xf32> to vector<8x128xf32>
    %97 = arith.mulf %86, %96 : vector<8x128xf32>
    %98 = arith.addf %95, %97 : vector<8x128xf32>
    %99 = math.tanh %98 : vector<8x128xf32>
    %cst_37 = arith.constant 1.000000e+00 : f32
    %100 = vector.broadcast %cst_37 : f32 to vector<8x128xf32>
    %101 = arith.subf %100, %94 : vector<8x128xf32>
    %102 = arith.mulf %101, %99 : vector<8x128xf32>
    %103 = arith.mulf %94, %68 : vector<8x128xf32>
    %104 = arith.addf %102, %103 : vector<8x128xf32>
    %105 = arith.index_cast %c1_i32 : i32 to index
    %c0_38 = arith.constant 0 : index
    %c0_39 = arith.constant 0 : index
    %106 = vector.load %arg7[%105, %c0_38, %c0_39] : memref<8x8x128xf32, #tpu.memory_space<vmem>>, vector<1x8x128xf32>
    %107 = vector.shape_cast %106 : vector<1x8x128xf32> to vector<8x128xf32>
    %108 = vector.shape_cast %104 : vector<8x128xf32> to vector<1x8x128xf32>
    tpu.vector_store %arg7[%105, %c0_38, %c0_39], %108 {strides = array<i32>} : memref<8x8x128xf32, #tpu.memory_space<vmem>>, vector<1x8x128xf32>,
    %c2_i32 = arith.constant 2 : i32
    %109 = arith.index_cast %c2_i32 : i32 to index
    %c0_40 = arith.constant 0 : index
    %c0_41 = arith.constant 0 : index
    %110 = vector.load %arg6[%109, %c0_40, %c0_41] : memref<8x8x384xf32, #tpu.memory_space<vmem>>, vector<1x8x384xf32>
    %111 = vector.shape_cast %110 : vector<1x8x384xf32> to vector<8x384xf32>
    %cst_42 = arith.constant dense<0.000000e+00> : vector<8x384xf32>
    %112 = tpu.matmul %104, %34, %cst_42 {dimension_numbers = #tpu.dot_dimension_numbers<[1], [0], [0], [1], [0, 0, 1, 1], [], []>} : vector<8x128xf32>, vector<128x384xf32>, vector<8x384xf32> -> vector<8x384xf32>
    %113 = vector.broadcast %35 : vector<1x384xf32> to vector<8x384xf32>
    %114 = arith.addf %112, %113 : vector<8x384xf32>
    %115 = vector.extract_strided_slice %111 {offsets = [0, 0], sizes = [8, 128], strides = [1, 1]} : vector<8x384xf32> to vector<8x128xf32>
    %116 = vector.extract_strided_slice %114 {offsets = [0, 0], sizes = [8, 128], strides = [1, 1]} : vector<8x384xf32> to vector<8x128xf32>
    %117 = arith.addf %115, %116 : vector<8x128xf32>
    %118 = arith.negf %117 : vector<8x128xf32>
    %119 = math.exp %118 : vector<8x128xf32>
    %cst_43 = arith.constant 1.000000e+00 : f32
    %120 = vector.broadcast %cst_43 : f32 to vector<8x128xf32>
    %121 = arith.addf %120, %119 : vector<8x128xf32>
    %122 = arith.divf %120, %121 : vector<8x128xf32>
    %123 = vector.extract_strided_slice %111 {offsets = [0, 128], sizes = [8, 128], strides = [1, 1]} : vector<8x384xf32> to vector<8x128xf32>
    %124 = vector.extract_strided_slice %114 {offsets = [0, 128], sizes = [8, 128], strides = [1, 1]} : vector<8x384xf32> to vector<8x128xf32>
    %125 = arith.addf %123, %124 : vector<8x128xf32>
    %126 = arith.negf %125 : vector<8x128xf32>
    %127 = math.exp %126 : vector<8x128xf32>
    %cst_44 = arith.constant 1.000000e+00 : f32
    %128 = vector.broadcast %cst_44 : f32 to vector<8x128xf32>
    %129 = arith.addf %128, %127 : vector<8x128xf32>
    %130 = arith.divf %128, %129 : vector<8x128xf32>
    %131 = vector.extract_strided_slice %111 {offsets = [0, 256], sizes = [8, 128], strides = [1, 1]} : vector<8x384xf32> to vector<8x128xf32>
    %132 = vector.extract_strided_slice %114 {offsets = [0, 256], sizes = [8, 128], strides = [1, 1]} : vector<8x384xf32> to vector<8x128xf32>
    %133 = arith.mulf %122, %132 : vector<8x128xf32>
    %134 = arith.addf %131, %133 : vector<8x128xf32>
    %135 = math.tanh %134 : vector<8x128xf32>
    %cst_45 = arith.constant 1.000000e+00 : f32
    %136 = vector.broadcast %cst_45 : f32 to vector<8x128xf32>
    %137 = arith.subf %136, %130 : vector<8x128xf32>
    %138 = arith.mulf %137, %135 : vector<8x128xf32>
    %139 = arith.mulf %130, %104 : vector<8x128xf32>
    %140 = arith.addf %138, %139 : vector<8x128xf32>
    %141 = arith.index_cast %c2_i32 : i32 to index
    %c0_46 = arith.constant 0 : index
    %c0_47 = arith.constant 0 : index
    %142 = vector.load %arg7[%141, %c0_46, %c0_47] : memref<8x8x128xf32, #tpu.memory_space<vmem>>, vector<1x8x128xf32>
    %143 = vector.shape_cast %142 : vector<1x8x128xf32> to vector<8x128xf32>
    %144 = vector.shape_cast %140 : vector<8x128xf32> to vector<1x8x128xf32>
    tpu.vector_store %arg7[%141, %c0_46, %c0_47], %144 {strides = array<i32>} : memref<8x8x128xf32, #tpu.memory_space<vmem>>, vector<1x8x128xf32>,
    %c3_i32 = arith.constant 3 : i32
    %145 = arith.index_cast %c3_i32 : i32 to index
    %c0_48 = arith.constant 0 : index
    %c0_49 = arith.constant 0 : index
    %146 = vector.load %arg6[%145, %c0_48, %c0_49] : memref<8x8x384xf32, #tpu.memory_space<vmem>>, vector<1x8x384xf32>
    %147 = vector.shape_cast %146 : vector<1x8x384xf32> to vector<8x384xf32>
    %cst_50 = arith.constant dense<0.000000e+00> : vector<8x384xf32>
    %148 = tpu.matmul %140, %34, %cst_50 {dimension_numbers = #tpu.dot_dimension_numbers<[1], [0], [0], [1], [0, 0, 1, 1], [], []>} : vector<8x128xf32>, vector<128x384xf32>, vector<8x384xf32> -> vector<8x384xf32>
    %149 = vector.broadcast %35 : vector<1x384xf32> to vector<8x384xf32>
    %150 = arith.addf %148, %149 : vector<8x384xf32>
    %151 = vector.extract_strided_slice %147 {offsets = [0, 0], sizes = [8, 128], strides = [1, 1]} : vector<8x384xf32> to vector<8x128xf32>
    %152 = vector.extract_strided_slice %150 {offsets = [0, 0], sizes = [8, 128], strides = [1, 1]} : vector<8x384xf32> to vector<8x128xf32>
    %153 = arith.addf %151, %152 : vector<8x128xf32>
    %154 = arith.negf %153 : vector<8x128xf32>
    %155 = math.exp %154 : vector<8x128xf32>
    %cst_51 = arith.constant 1.000000e+00 : f32
    %156 = vector.broadcast %cst_51 : f32 to vector<8x128xf32>
    %157 = arith.addf %156, %155 : vector<8x128xf32>
    %158 = arith.divf %156, %157 : vector<8x128xf32>
    %159 = vector.extract_strided_slice %147 {offsets = [0, 128], sizes = [8, 128], strides = [1, 1]} : vector<8x384xf32> to vector<8x128xf32>
    %160 = vector.extract_strided_slice %150 {offsets = [0, 128], sizes = [8, 128], strides = [1, 1]} : vector<8x384xf32> to vector<8x128xf32>
    %161 = arith.addf %159, %160 : vector<8x128xf32>
    %162 = arith.negf %161 : vector<8x128xf32>
    %163 = math.exp %162 : vector<8x128xf32>
    %cst_52 = arith.constant 1.000000e+00 : f32
    %164 = vector.broadcast %cst_52 : f32 to vector<8x128xf32>
    %165 = arith.addf %164, %163 : vector<8x128xf32>
    %166 = arith.divf %164, %165 : vector<8x128xf32>
    %167 = vector.extract_strided_slice %147 {offsets = [0, 256], sizes = [8, 128], strides = [1, 1]} : vector<8x384xf32> to vector<8x128xf32>
    %168 = vector.extract_strided_slice %150 {offsets = [0, 256], sizes = [8, 128], strides = [1, 1]} : vector<8x384xf32> to vector<8x128xf32>
    %169 = arith.mulf %158, %168 : vector<8x128xf32>
    %170 = arith.addf %167, %169 : vector<8x128xf32>
    %171 = math.tanh %170 : vector<8x128xf32>
    %cst_53 = arith.constant 1.000000e+00 : f32
    %172 = vector.broadcast %cst_53 : f32 to vector<8x128xf32>
    %173 = arith.subf %172, %166 : vector<8x128xf32>
    %174 = arith.mulf %173, %171 : vector<8x128xf32>
    %175 = arith.mulf %166, %140 : vector<8x128xf32>
    %176 = arith.addf %174, %175 : vector<8x128xf32>
    %177 = arith.index_cast %c3_i32 : i32 to index
    %c0_54 = arith.constant 0 : index
    %c0_55 = arith.constant 0 : index
    %178 = vector.load %arg7[%177, %c0_54, %c0_55] : memref<8x8x128xf32, #tpu.memory_space<vmem>>, vector<1x8x128xf32>
    %179 = vector.shape_cast %178 : vector<1x8x128xf32> to vector<8x128xf32>
    %180 = vector.shape_cast %176 : vector<8x128xf32> to vector<1x8x128xf32>
    tpu.vector_store %arg7[%177, %c0_54, %c0_55], %180 {strides = array<i32>} : memref<8x8x128xf32, #tpu.memory_space<vmem>>, vector<1x8x128xf32>,
    %c4_i32 = arith.constant 4 : i32
    %181 = arith.index_cast %c4_i32 : i32 to index
    %c0_56 = arith.constant 0 : index
    %c0_57 = arith.constant 0 : index
    %182 = vector.load %arg6[%181, %c0_56, %c0_57] : memref<8x8x384xf32, #tpu.memory_space<vmem>>, vector<1x8x384xf32>
    %183 = vector.shape_cast %182 : vector<1x8x384xf32> to vector<8x384xf32>
    %cst_58 = arith.constant dense<0.000000e+00> : vector<8x384xf32>
    %184 = tpu.matmul %176, %34, %cst_58 {dimension_numbers = #tpu.dot_dimension_numbers<[1], [0], [0], [1], [0, 0, 1, 1], [], []>} : vector<8x128xf32>, vector<128x384xf32>, vector<8x384xf32> -> vector<8x384xf32>
    %185 = vector.broadcast %35 : vector<1x384xf32> to vector<8x384xf32>
    %186 = arith.addf %184, %185 : vector<8x384xf32>
    %187 = vector.extract_strided_slice %183 {offsets = [0, 0], sizes = [8, 128], strides = [1, 1]} : vector<8x384xf32> to vector<8x128xf32>
    %188 = vector.extract_strided_slice %186 {offsets = [0, 0], sizes = [8, 128], strides = [1, 1]} : vector<8x384xf32> to vector<8x128xf32>
    %189 = arith.addf %187, %188 : vector<8x128xf32>
    %190 = arith.negf %189 : vector<8x128xf32>
    %191 = math.exp %190 : vector<8x128xf32>
    %cst_59 = arith.constant 1.000000e+00 : f32
    %192 = vector.broadcast %cst_59 : f32 to vector<8x128xf32>
    %193 = arith.addf %192, %191 : vector<8x128xf32>
    %194 = arith.divf %192, %193 : vector<8x128xf32>
    %195 = vector.extract_strided_slice %183 {offsets = [0, 128], sizes = [8, 128], strides = [1, 1]} : vector<8x384xf32> to vector<8x128xf32>
    %196 = vector.extract_strided_slice %186 {offsets = [0, 128], sizes = [8, 128], strides = [1, 1]} : vector<8x384xf32> to vector<8x128xf32>
    %197 = arith.addf %195, %196 : vector<8x128xf32>
    %198 = arith.negf %197 : vector<8x128xf32>
    %199 = math.exp %198 : vector<8x128xf32>
    %cst_60 = arith.constant 1.000000e+00 : f32
    %200 = vector.broadcast %cst_60 : f32 to vector<8x128xf32>
    %201 = arith.addf %200, %199 : vector<8x128xf32>
    %202 = arith.divf %200, %201 : vector<8x128xf32>
    %203 = vector.extract_strided_slice %183 {offsets = [0, 256], sizes = [8, 128], strides = [1, 1]} : vector<8x384xf32> to vector<8x128xf32>
    %204 = vector.extract_strided_slice %186 {offsets = [0, 256], sizes = [8, 128], strides = [1, 1]} : vector<8x384xf32> to vector<8x128xf32>
    %205 = arith.mulf %194, %204 : vector<8x128xf32>
    %206 = arith.addf %203, %205 : vector<8x128xf32>
    %207 = math.tanh %206 : vector<8x128xf32>
    %cst_61 = arith.constant 1.000000e+00 : f32
    %208 = vector.broadcast %cst_61 : f32 to vector<8x128xf32>
    %209 = arith.subf %208, %202 : vector<8x128xf32>
    %210 = arith.mulf %209, %207 : vector<8x128xf32>
    %211 = arith.mulf %202, %176 : vector<8x128xf32>
    %212 = arith.addf %210, %211 : vector<8x128xf32>
    %213 = arith.index_cast %c4_i32 : i32 to index
    %c0_62 = arith.constant 0 : index
    %c0_63 = arith.constant 0 : index
    %214 = vector.load %arg7[%213, %c0_62, %c0_63] : memref<8x8x128xf32, #tpu.memory_space<vmem>>, vector<1x8x128xf32>
    %215 = vector.shape_cast %214 : vector<1x8x128xf32> to vector<8x128xf32>
    %216 = vector.shape_cast %212 : vector<8x128xf32> to vector<1x8x128xf32>
    tpu.vector_store %arg7[%213, %c0_62, %c0_63], %216 {strides = array<i32>} : memref<8x8x128xf32, #tpu.memory_space<vmem>>, vector<1x8x128xf32>,
    %c5_i32 = arith.constant 5 : i32
    %217 = arith.index_cast %c5_i32 : i32 to index
    %c0_64 = arith.constant 0 : index
    %c0_65 = arith.constant 0 : index
    %218 = vector.load %arg6[%217, %c0_64, %c0_65] : memref<8x8x384xf32, #tpu.memory_space<vmem>>, vector<1x8x384xf32>
    %219 = vector.shape_cast %218 : vector<1x8x384xf32> to vector<8x384xf32>
    %cst_66 = arith.constant dense<0.000000e+00> : vector<8x384xf32>
    %220 = tpu.matmul %212, %34, %cst_66 {dimension_numbers = #tpu.dot_dimension_numbers<[1], [0], [0], [1], [0, 0, 1, 1], [], []>} : vector<8x128xf32>, vector<128x384xf32>, vector<8x384xf32> -> vector<8x384xf32>
    %221 = vector.broadcast %35 : vector<1x384xf32> to vector<8x384xf32>
    %222 = arith.addf %220, %221 : vector<8x384xf32>
    %223 = vector.extract_strided_slice %219 {offsets = [0, 0], sizes = [8, 128], strides = [1, 1]} : vector<8x384xf32> to vector<8x128xf32>
    %224 = vector.extract_strided_slice %222 {offsets = [0, 0], sizes = [8, 128], strides = [1, 1]} : vector<8x384xf32> to vector<8x128xf32>
    %225 = arith.addf %223, %224 : vector<8x128xf32>
    %226 = arith.negf %225 : vector<8x128xf32>
    %227 = math.exp %226 : vector<8x128xf32>
    %cst_67 = arith.constant 1.000000e+00 : f32
    %228 = vector.broadcast %cst_67 : f32 to vector<8x128xf32>
    %229 = arith.addf %228, %227 : vector<8x128xf32>
    %230 = arith.divf %228, %229 : vector<8x128xf32>
    %231 = vector.extract_strided_slice %219 {offsets = [0, 128], sizes = [8, 128], strides = [1, 1]} : vector<8x384xf32> to vector<8x128xf32>
    %232 = vector.extract_strided_slice %222 {offsets = [0, 128], sizes = [8, 128], strides = [1, 1]} : vector<8x384xf32> to vector<8x128xf32>
    %233 = arith.addf %231, %232 : vector<8x128xf32>
    %234 = arith.negf %233 : vector<8x128xf32>
    %235 = math.exp %234 : vector<8x128xf32>
    %cst_68 = arith.constant 1.000000e+00 : f32
    %236 = vector.broadcast %cst_68 : f32 to vector<8x128xf32>
    %237 = arith.addf %236, %235 : vector<8x128xf32>
    %238 = arith.divf %236, %237 : vector<8x128xf32>
    %239 = vector.extract_strided_slice %219 {offsets = [0, 256], sizes = [8, 128], strides = [1, 1]} : vector<8x384xf32> to vector<8x128xf32>
    %240 = vector.extract_strided_slice %222 {offsets = [0, 256], sizes = [8, 128], strides = [1, 1]} : vector<8x384xf32> to vector<8x128xf32>
    %241 = arith.mulf %230, %240 : vector<8x128xf32>
    %242 = arith.addf %239, %241 : vector<8x128xf32>
    %243 = math.tanh %242 : vector<8x128xf32>
    %cst_69 = arith.constant 1.000000e+00 : f32
    %244 = vector.broadcast %cst_69 : f32 to vector<8x128xf32>
    %245 = arith.subf %244, %238 : vector<8x128xf32>
    %246 = arith.mulf %245, %243 : vector<8x128xf32>
    %247 = arith.mulf %238, %212 : vector<8x128xf32>
    %248 = arith.addf %246, %247 : vector<8x128xf32>
    %249 = arith.index_cast %c5_i32 : i32 to index
    %c0_70 = arith.constant 0 : index
    %c0_71 = arith.constant 0 : index
    %250 = vector.load %arg7[%249, %c0_70, %c0_71] : memref<8x8x128xf32, #tpu.memory_space<vmem>>, vector<1x8x128xf32>
    %251 = vector.shape_cast %250 : vector<1x8x128xf32> to vector<8x128xf32>
    %252 = vector.shape_cast %248 : vector<8x128xf32> to vector<1x8x128xf32>
    tpu.vector_store %arg7[%249, %c0_70, %c0_71], %252 {strides = array<i32>} : memref<8x8x128xf32, #tpu.memory_space<vmem>>, vector<1x8x128xf32>,
    %c6_i32 = arith.constant 6 : i32
    %253 = arith.index_cast %c6_i32 : i32 to index
    %c0_72 = arith.constant 0 : index
    %c0_73 = arith.constant 0 : index
    %254 = vector.load %arg6[%253, %c0_72, %c0_73] : memref<8x8x384xf32, #tpu.memory_space<vmem>>, vector<1x8x384xf32>
    %255 = vector.shape_cast %254 : vector<1x8x384xf32> to vector<8x384xf32>
    %cst_74 = arith.constant dense<0.000000e+00> : vector<8x384xf32>
    %256 = tpu.matmul %248, %34, %cst_74 {dimension_numbers = #tpu.dot_dimension_numbers<[1], [0], [0], [1], [0, 0, 1, 1], [], []>} : vector<8x128xf32>, vector<128x384xf32>, vector<8x384xf32> -> vector<8x384xf32>
    %257 = vector.broadcast %35 : vector<1x384xf32> to vector<8x384xf32>
    %258 = arith.addf %256, %257 : vector<8x384xf32>
    %259 = vector.extract_strided_slice %255 {offsets = [0, 0], sizes = [8, 128], strides = [1, 1]} : vector<8x384xf32> to vector<8x128xf32>
    %260 = vector.extract_strided_slice %258 {offsets = [0, 0], sizes = [8, 128], strides = [1, 1]} : vector<8x384xf32> to vector<8x128xf32>
    %261 = arith.addf %259, %260 : vector<8x128xf32>
    %262 = arith.negf %261 : vector<8x128xf32>
    %263 = math.exp %262 : vector<8x128xf32>
    %cst_75 = arith.constant 1.000000e+00 : f32
    %264 = vector.broadcast %cst_75 : f32 to vector<8x128xf32>
    %265 = arith.addf %264, %263 : vector<8x128xf32>
    %266 = arith.divf %264, %265 : vector<8x128xf32>
    %267 = vector.extract_strided_slice %255 {offsets = [0, 128], sizes = [8, 128], strides = [1, 1]} : vector<8x384xf32> to vector<8x128xf32>
    %268 = vector.extract_strided_slice %258 {offsets = [0, 128], sizes = [8, 128], strides = [1, 1]} : vector<8x384xf32> to vector<8x128xf32>
    %269 = arith.addf %267, %268 : vector<8x128xf32>
    %270 = arith.negf %269 : vector<8x128xf32>
    %271 = math.exp %270 : vector<8x128xf32>
    %cst_76 = arith.constant 1.000000e+00 : f32
    %272 = vector.broadcast %cst_76 : f32 to vector<8x128xf32>
    %273 = arith.addf %272, %271 : vector<8x128xf32>
    %274 = arith.divf %272, %273 : vector<8x128xf32>
    %275 = vector.extract_strided_slice %255 {offsets = [0, 256], sizes = [8, 128], strides = [1, 1]} : vector<8x384xf32> to vector<8x128xf32>
    %276 = vector.extract_strided_slice %258 {offsets = [0, 256], sizes = [8, 128], strides = [1, 1]} : vector<8x384xf32> to vector<8x128xf32>
    %277 = arith.mulf %266, %276 : vector<8x128xf32>
    %278 = arith.addf %275, %277 : vector<8x128xf32>
    %279 = math.tanh %278 : vector<8x128xf32>
    %cst_77 = arith.constant 1.000000e+00 : f32
    %280 = vector.broadcast %cst_77 : f32 to vector<8x128xf32>
    %281 = arith.subf %280, %274 : vector<8x128xf32>
    %282 = arith.mulf %281, %279 : vector<8x128xf32>
    %283 = arith.mulf %274, %248 : vector<8x128xf32>
    %284 = arith.addf %282, %283 : vector<8x128xf32>
    %285 = arith.index_cast %c6_i32 : i32 to index
    %c0_78 = arith.constant 0 : index
    %c0_79 = arith.constant 0 : index
    %286 = vector.load %arg7[%285, %c0_78, %c0_79] : memref<8x8x128xf32, #tpu.memory_space<vmem>>, vector<1x8x128xf32>
    %287 = vector.shape_cast %286 : vector<1x8x128xf32> to vector<8x128xf32>
    %288 = vector.shape_cast %284 : vector<8x128xf32> to vector<1x8x128xf32>
    tpu.vector_store %arg7[%285, %c0_78, %c0_79], %288 {strides = array<i32>} : memref<8x8x128xf32, #tpu.memory_space<vmem>>, vector<1x8x128xf32>,
    %c7_i32 = arith.constant 7 : i32
    %289 = arith.index_cast %c7_i32 : i32 to index
    %c0_80 = arith.constant 0 : index
    %c0_81 = arith.constant 0 : index
    %290 = vector.load %arg6[%289, %c0_80, %c0_81] : memref<8x8x384xf32, #tpu.memory_space<vmem>>, vector<1x8x384xf32>
    %291 = vector.shape_cast %290 : vector<1x8x384xf32> to vector<8x384xf32>
    %cst_82 = arith.constant dense<0.000000e+00> : vector<8x384xf32>
    %292 = tpu.matmul %284, %34, %cst_82 {dimension_numbers = #tpu.dot_dimension_numbers<[1], [0], [0], [1], [0, 0, 1, 1], [], []>} : vector<8x128xf32>, vector<128x384xf32>, vector<8x384xf32> -> vector<8x384xf32>
    %293 = vector.broadcast %35 : vector<1x384xf32> to vector<8x384xf32>
    %294 = arith.addf %292, %293 : vector<8x384xf32>
    %295 = vector.extract_strided_slice %291 {offsets = [0, 0], sizes = [8, 128], strides = [1, 1]} : vector<8x384xf32> to vector<8x128xf32>
    %296 = vector.extract_strided_slice %294 {offsets = [0, 0], sizes = [8, 128], strides = [1, 1]} : vector<8x384xf32> to vector<8x128xf32>
    %297 = arith.addf %295, %296 : vector<8x128xf32>
    %298 = arith.negf %297 : vector<8x128xf32>
    %299 = math.exp %298 : vector<8x128xf32>
    %cst_83 = arith.constant 1.000000e+00 : f32
    %300 = vector.broadcast %cst_83 : f32 to vector<8x128xf32>
    %301 = arith.addf %300, %299 : vector<8x128xf32>
    %302 = arith.divf %300, %301 : vector<8x128xf32>
    %303 = vector.extract_strided_slice %291 {offsets = [0, 128], sizes = [8, 128], strides = [1, 1]} : vector<8x384xf32> to vector<8x128xf32>
    %304 = vector.extract_strided_slice %294 {offsets = [0, 128], sizes = [8, 128], strides = [1, 1]} : vector<8x384xf32> to vector<8x128xf32>
    %305 = arith.addf %303, %304 : vector<8x128xf32>
    %306 = arith.negf %305 : vector<8x128xf32>
    %307 = math.exp %306 : vector<8x128xf32>
    %cst_84 = arith.constant 1.000000e+00 : f32
    %308 = vector.broadcast %cst_84 : f32 to vector<8x128xf32>
    %309 = arith.addf %308, %307 : vector<8x128xf32>
    %310 = arith.divf %308, %309 : vector<8x128xf32>
    %311 = vector.extract_strided_slice %291 {offsets = [0, 256], sizes = [8, 128], strides = [1, 1]} : vector<8x384xf32> to vector<8x128xf32>
    %312 = vector.extract_strided_slice %294 {offsets = [0, 256], sizes = [8, 128], strides = [1, 1]} : vector<8x384xf32> to vector<8x128xf32>
    %313 = arith.mulf %302, %312 : vector<8x128xf32>
    %314 = arith.addf %311, %313 : vector<8x128xf32>
    %315 = math.tanh %314 : vector<8x128xf32>
    %cst_85 = arith.constant 1.000000e+00 : f32
    %316 = vector.broadcast %cst_85 : f32 to vector<8x128xf32>
    %317 = arith.subf %316, %310 : vector<8x128xf32>
    %318 = arith.mulf %317, %315 : vector<8x128xf32>
    %319 = arith.mulf %310, %284 : vector<8x128xf32>
    %320 = arith.addf %318, %319 : vector<8x128xf32>
    %321 = arith.index_cast %c7_i32 : i32 to index
    %c0_86 = arith.constant 0 : index
    %c0_87 = arith.constant 0 : index
    %322 = vector.load %arg7[%321, %c0_86, %c0_87] : memref<8x8x128xf32, #tpu.memory_space<vmem>>, vector<1x8x128xf32>
    %323 = vector.shape_cast %322 : vector<1x8x128xf32> to vector<8x128xf32>
    %324 = vector.shape_cast %320 : vector<8x128xf32> to vector<1x8x128xf32>
    tpu.vector_store %arg7[%321, %c0_86, %c0_87], %324 {strides = array<i32>} : memref<8x8x128xf32, #tpu.memory_space<vmem>>, vector<1x8x128xf32>,
    %c8_i32 = arith.constant 8 : i32
    %c0_88 = arith.constant 0 : index
    %c0_89 = arith.constant 0 : index
    %c0_90 = arith.constant 0 : index
    %325 = vector.load %arg7[%c0_88, %c0_89, %c0_90] : memref<8x8x128xf32, #tpu.memory_space<vmem>>, vector<8x8x128xf32>
    %326 = vector.shape_cast %325 : vector<8x8x128xf32> to vector<64x128xf32>
    %c240 = arith.constant 240 : index
    %c0_91 = arith.constant 0 : index
    %327 = vector.load %arg3[%c240, %c0_91] : memref<368x384xf32, #tpu.memory_space<vmem>>, vector<128x128xf32>
    %cst_92 = arith.constant dense<0.000000e+00> : vector<64x128xf32>
    %328 = tpu.matmul %326, %327, %cst_92 {dimension_numbers = #tpu.dot_dimension_numbers<[1], [0], [0], [1], [0, 0, 1, 1], [], []>} : vector<64x128xf32>, vector<128x128xf32>, vector<64x128xf32> -> vector<64x128xf32>
    %c4 = arith.constant 4 : index
    %c0_93 = arith.constant 0 : index
    %329 = vector.load %arg4[%c4, %c0_93] : memref<8x384xf32, #tpu.memory_space<vmem>>, vector<1x128xf32>
    %330 = vector.broadcast %329 : vector<1x128xf32> to vector<64x128xf32>
    %331 = arith.addf %328, %330 : vector<64x128xf32>
    %c0_94 = arith.constant 0 : index
    %c0_95 = arith.constant 0 : index
    %332 = vector.load %arg5[%c0_94, %c0_95] : memref<64x128xf32, #tpu.memory_space<vmem>>, vector<64x128xf32>
    tpu.vector_store %arg5[%c0_94, %c0_95], %331 {strides = array<i32>} : memref<64x128xf32, #tpu.memory_space<vmem>>, vector<64x128xf32>,
    return
  }
  func.func @transform_0(%arg0: i32) -> (i32, i32) {
    %c0_i32 = arith.constant 0 : i32
    %c0_i32_0 = arith.constant 0 : i32
    %c0_i32_1 = arith.constant 0 : i32
    return %c0_i32, %c0_i32_0 : i32, i32
  }
  func.func @transform_1(%arg0: i32) -> (i32, i32) {
    %c0_i32 = arith.constant 0 : i32
    %c0_i32_0 = arith.constant 0 : i32
    %c0_i32_1 = arith.constant 0 : i32
    return %c0_i32, %c0_i32_0 : i32, i32
  }
  func.func @transform_2(%arg0: i32) -> (i32, i32) {
    %c0_i32 = arith.constant 0 : i32
    %c0_i32_0 = arith.constant 0 : i32
    %c0_i32_1 = arith.constant 0 : i32
    return %c0_i32, %c0_i32_0 : i32, i32
  }
  func.func @transform_3(%arg0: i32) -> (i32, i32) {
    %c0_i32 = arith.constant 0 : i32
    %c0_i32_0 = arith.constant 0 : i32
    %c0_i32_1 = arith.constant 0 : i32
    return %c0_i32, %c0_i32_0 : i32, i32
  }
  func.func @transform_4(%arg0: i32) -> (i32, i32) {
    %c0_i32 = arith.constant 0 : i32
    %c0_i32_0 = arith.constant 0 : i32
    %c0_i32_1 = arith.constant 0 : i32
    return %c0_i32, %c0_i32_0 : i32, i32
  }
}

</mosaic_0001>

<bundles_post_ra>
// kernel: task_encoder_rnn_forward_seq.1
= control target key start
LH: loop header
LB: loop body
LE: loop exit
PB: predicated region body
PF: predicated region fallthrough
CT: control target
= control target key end

     0   :  { %9 = vsyncpa [#allocation5], 0  ;;  %s3736_s15 = smov [#allocation4]   ;;  %s4414_s0 = inlined_call_operand.vmem [shape: f32[64,48], index: 0, kind: input, shape index: {}]   ;;  %s4415_s1 = inlined_call_operand.vmem [shape: f32[8,128], index: 1, kind: input, shape index: {}]   ;;  %s4416_s2 = inlined_call_operand.hbm [shape: f32[368,384], index: 2, kind: input, shape index: {}]   ;;  %s4417_s3 = inlined_call_operand.vmem [shape: f32[8,384], index: 3, kind: input, shape index: {}]   ;;  %s4418_s4 = inlined_call_operand.vmem [shape: f32[64,128], index: 4, kind: output, shape index: {}]  }
   0x1   :  { %s19_s16 = sshll.u32 %s3736_s15, 4  ;;  %s3712_s19 = scalar_lea.hbm %s4416_s2, 17664  ;;  %s20_s16 = int_to_ptr.vmem [resolvable:$true] %s19_s16 }
   0x2   :  { %p3713_p0 = scmp.ne.s32.totalorder %s4416_s2, %s3712_s19  ;;  %p3716_p1 = scmp.lt.u32.totalorder %s3712_s19, %s4416_s2 }
   0x4   :  { %p3718_p2 = pnand %p3716_p1, %p3713_p0 }
   0x6   :  { %3721 = shalt.err (!%p3718_p2)
}
   0x7   :  { %s3722_s24 = scalar_lea.vmem %s20_s16, 17664  ;;  %p3727_p4 = scmp.lt.s32.totalorder %s20_s16, %s20_s16 }
   0x8   :  { %p3723_p3 = scmp.ne.s32.totalorder %s20_s16, %s3722_s24  ;;  %p3728_p5 = scmp.lt.s32.totalorder %s3722_s24, %s3722_s24 }
   0xa   :  { %p3729_p6 = por %p3728_p5, %p3727_p4 }
   0xc   :  { %p3730_p7 = pnand %p3729_p6, %p3723_p3 }
   0xe   :  { %3733 = shalt.err (!%p3730_p7)
}
   0xf   :  { %s3737_s25 = smov 384   ;;  %s3738_s26 = smov 24  }
  0x10   :  { %25 = dma.hbm_to_vmem [thread:$0]  %s4416_s2, 17664, %s20_s16, [#allocation5], %s3737_s25, %s3737_s25, %s3738_s26  }
  0x11   :  { %3734 = dma.done.wait [#allocation5], 17664  }
  0x12   :  { %3735 = vsyncadd [#allocation5], 4294949632  ;;  %vm43_vm0 = vcmask 195584   ;;  %v39_v0 = vld [vmem:[#allocation4] sm:$0xff]  ;;  %v40_v1 = vld [vmem:[#allocation4 + $0x18] sm:$0xff]  ;;  %vm181_vm1 = vcmask 261120  }
  0x13   :  { %v3041_v2 = vpack.c.bf16 %v40_v1, %v39_v0  ;;  %v3783_v3 = vld [vmem:[%s4414_s0] sm:$0xff]  ;;  %v41_v4 = vld [vmem:[#allocation4 + $0x30] sm:$0xff]  ;;  %v3790_v5 = vld [vmem:[%s4414_s0 + $0x8] sm:$0xff]  ;;  %vm3742_vm2 = vmmov 0  }
  0x14   :  { %2647 = vmatprep.mubr.msk.f32.mxu1 %vm43_vm0, %v3783_v3  ;;  %v3795_v6 = vld [vmem:[%s4414_s0 + $0x10] sm:$0xff]  ;;  %v3804_v7 = vld [vmem:[%s4414_s0 + $0x18] sm:$0xff]  ;;  %v3809_v8 = vld [vmem:[%s4414_s0 + $0x20] sm:$0xff] }
  0x15   :  { %3042 = vmatprep.subr.bf16.mxu1 %v3041_v2  ;;  %v3818_v9 = vld [vmem:[%s4414_s0 + $0x28] sm:$0xff]  ;;  %v3823_v10 = vld [vmem:[%s4414_s0 + $0x30] sm:$0xff]  ;;  %v3832_v11 = vld [vmem:[%s4414_s0 + $0x38] sm:$0xff]  ;;  %s3739_s0 = smov 104  }
  0x16   :  { %3044 = vmatpush3.bf16.msra.mxu1 %v3041_v2  ;;  %v42_v12 = vld [vmem:[%s4417_s3] ss:$0 sm:$0xff]  ;;  %v242_v45 = vld [vmem:[#allocation4 + $0x90] sm:$0xff]  ;;  %v243_v46 = vld [vmem:[#allocation4 + $0xa8] sm:$0xff] }
  0x17   :  { %2645 = vmatprep.subr.mxu1 %v41_v4  ;;  %v3045_v47 = vpack.c.bf16 %v243_v46, %v242_v45  ;;  %v244_v48 = vld [vmem:[#allocation4 + $0xc0] sm:$0xff]  ;;  %v245_v49 = vld [vmem:[#allocation4 + $0xd8] sm:$0xff]  ;;  %v239_v51 = vld [vmem:[#allocation4 + $0x48] sm:$0xff] }
  0x18   :  { %v3049_v50 = vpack.c.bf16 %v245_v49, %v244_v48  ;;  %v240_v52 = vld [vmem:[#allocation4 + $0x60] sm:$0xff]  ;;  %v530_v54 = vld [vmem:[#allocation4 + $0xf8] sm:$0xff]  ;;  %v533_v55 = vld [vmem:[#allocation4 + $0x110] sm:$0xff] }
  0x19   :  { %v3053_v53 = vpack.c.bf16 %v240_v52, %v239_v51  ;;  %v529_v56 = vld [vmem:[#allocation4 + $0xf0] sm:$0xff]  ;;  %v3057_v57 = vpack.c.bf16 %v533_v55, %v530_v54  ;;  %v532_v58 = vld [vmem:[#allocation4 + $0x108] sm:$0xff]  ;;  %v539_v49 = vld [vmem:[#allocation4 + $0x140] sm:$0xff] }
  0x1a   :  { %2646 = vmatpush3.msra.mxu1 %v41_v4  ;;  %v3059_v59 = vpack.c.bf16 %v532_v58, %v529_v56  ;;  %v536_v48 = vld [vmem:[#allocation4 + $0x128] sm:$0xff]  ;;  %v535_v51 = vld [vmem:[#allocation4 + $0x120] sm:$0xff]  ;;  %v538_v52 = vld [vmem:[#allocation4 + $0x138] sm:$0xff] }
  0x1b   :  { %2648 = vmatmul.mubr.msk.f32.vlgmr.msra.gmra.mrb[0].mxu1 %vm43_vm0, %v3790_v5  ;;  %3046 = vmatprep.subr.bf16.mxu1 %v3045_v47  ;;  %v537_v54 = vld [vmem:[#allocation4 + $0x130] sm:$0xff]  ;;  %v540_v55 = vld [vmem:[#allocation4 + $0x148] sm:$0xff] }
  0x1c   :  { %2650 = vmatprep.mubr.msk.f32.mxu1 %vm43_vm0, %v3795_v6  ;;  %3048 = vmatpush3.bf16.msra.mxu1 %v3045_v47  ;;  %v3069_v56 = vpack.c.bf16 %v540_v55, %v537_v54  ;;  %v829_v58 = vld [vmem:[#allocation4 + $0x170] sm:$0xff]  ;;  %v852_v55 = vld [vmem:[#allocation4 + $0x228] sm:$0xff] }
  0x1d   :  { %3050 = vmatprep.subr.bf16.mxu1 %v3049_v50  ;;  %3058 = vmatprep.subr.bf16.mxu0 %v3057_v57  ;;  %v826_v57 = vld [vmem:[#allocation4 + $0x158] sm:$0xff]  ;;  %v849_v54 = vld [vmem:[#allocation4 + $0x210] sm:$0xff] }
  0x1e   :  { %3060 = vmatpush1.bf16.msra.mxu0 %v3059_v59  ;;  %v3903_v59 = vpack.c.bf16 %v829_v58, %v826_v57  ;;  %v856_v57 = vld [vmem:[#allocation4 + $0x248] sm:$0xff]  ;;  %v859_v58 = vld [vmem:[#allocation4 + $0x260] sm:$0xff] }
  0x1f   :  { %2651 = vmatmul.mubr.msk.f32.gmra.mrb[2].mxu1 %vm43_vm0, %v3804_v7 }
  0x20   :  { %2653 = vmatprep.mubr.msk.f32.mxu1 %vm43_vm0, %v3809_v8  ;;  %3052 = vmatpush3.bf16.msra.mxu1 %v3049_v50  ;;  %v3061_v50 = vpack.c.bf16 %v539_v49, %v536_v48 }
  0x21   :  { %3054 = vmatprep.subr.bf16.mxu1 %v3053_v53 }
  0x22   :  { %3062 = vmatprep.subr.bf16.mxu0 %v3061_v50  ;;  %v839_v50 = vld [vmem:[#allocation4 + $0x1c0] sm:$0xff] }
  0x23   :  { %2654 = vmatmul.mubr.msk.f32.gmra.mrb[4].mxu1 %vm43_vm0, %v3818_v9 }
  0x24   :  { %2656 = vmatprep.mubr.msk.f32.mxu1 %vm43_vm0, %v3823_v10 }
  0x27   :  { %2657 = vmatmul.mubr.msk.f32.gmra.mrb[6].mxu1 %vm43_vm0, %v3832_v11 }
  0xee   :  { %v2649_v13 = vpop.f32.mrb[0].mxu1 }
  0xef   :  { %v134_v14 = vpop.f32.mrb[1].mxu1  ;;  %v3839_v15 = vadd.f32 %v2649_v13, %v42_v12 }
  0xf0   :  { %v3841_v16 = vadd.f32 %v134_v14, %v42_v12 }
  0xf1   :  { %v174_v23 = vand.u32 2147483647, %v3839_v15 }
  0xf2   :  { %v2652_v17 = vpop.f32.mrb[2].mxu1  ;;  %v173_v18 = vand.u32 2147483647, %v3841_v16 }
  0xf3   :  { %v3844_v19 = vadd.f32 %v2652_v17, %v42_v12  ;;  %v144_v20 = vpop.f32.mrb[3].mxu1  ;;  %v185_v31 = vsel %vm181_vm1, %v174_v23, 0.0 }
  0xf4   :  { %v3846_v21 = vadd.f32 %v144_v20, %v42_v12  ;;  %v182_v22 = vsel %vm181_vm1, %v173_v18, 0.0 }
  0xf5   :  { %183 = vadd.xlane.f32.xlu0 %v182_v22  ;;  %v176_v24 = vand.u32 2147483647, %v3844_v19 }
  0xf6   :  { %v2655_v25 = vpop.f32.mrb[4].mxu1  ;;  %v175_v29 = vand.u32 2147483647, %v3846_v21 }
  0xf7   :  { %v3851_v26 = vadd.f32 %v2655_v25, %v42_v12  ;;  %v154_v27 = vpop.f32.mrb[5].mxu1  ;;  %v191_v28 = vsel %vm181_vm1, %v176_v24, 0.0 }
  0xf8   :  { %v3855_v30 = vadd.f32 %v154_v27, %v42_v12  ;;  %192 = vadd.xlane.f32.xlu1 %v191_v28  ;;  %v188_v37 = vsel %vm181_vm1, %v175_v29, 0.0 }
  0xf9   :  { %186 = vadd.xlane.f32.xlu0 %v185_v31  ;;  %v178_v32 = vand.u32 2147483647, %v3851_v26  ;;  %v241_v31 = vld [vmem:[#allocation4 + $0x78] sm:$0xff] }
  0xfa   :  { %v2658_v33 = vpop.f32.mrb[6].mxu1  ;;  %v177_v34 = vand.u32 2147483647, %v3855_v30 }
  0xfb   :  { %v3860_v35 = vadd.f32 %v2658_v33, %v42_v12  ;;  %v164_v36 = vpop.f32.mrb[7].mxu1  ;;  %v197_v40 = vsel %vm181_vm1, %v178_v32, 0.0  ;;  %v531_v32 = vld [vmem:[#allocation4 + $0x100] sm:$0xff]  ;;  %v534_v33 = vld [vmem:[#allocation4 + $0x118] sm:$0xff] }
  0xfc   :  { %v3863_v38 = vadd.f32 %v164_v36, %v42_v12  ;;  %189 = vadd.xlane.f32.xlu1 %v188_v37  ;;  %v194_v39 = vsel %vm181_vm1, %v177_v34, 0.0 }
  0xfd   :  { %195 = vadd.xlane.f32.xlu0 %v194_v39  ;;  %v180_v41 = vand.u32 2147483647, %v3860_v35 }
  0xfe   :  { %v179_v42 = vand.u32 2147483647, %v3863_v38 }
  0xff   :  { %v203_v44 = vsel %vm181_vm1, %v180_v41, 0.0  ;;  %v3065_v41 = vpack.c.bf16 %v534_v33, %v531_v32  ;;  %v837_v32 = vld [vmem:[#allocation4 + $0x1b0] sm:$0xff]  ;;  %v840_v33 = vld [vmem:[#allocation4 + $0x1c8] sm:$0xff] }
 0x100   :  { %198 = vadd.xlane.f32.xlu1 %v197_v40  ;;  %v200_v43 = vsel %vm181_vm1, %v179_v42, 0.0 }
 0x101   :  { %201 = vadd.xlane.f32.xlu0 %v200_v43 }
 0x104   :  { %204 = vadd.xlane.f32.xlu1 %v203_v44 }
 0x115   :  { %377 = vrot.lane.b32.xlu1 %v3790_v5, %s3739_s0 }
 0x117   :  { %375 = vrot.lane.b32.xlu0 %v3783_v3, %s3739_s0 }
 0x119   :  { %379 = vrot.lane.b32.xlu1 %v3795_v6, %s3739_s0 }
 0x11b   :  { %383 = vrot.lane.b32.xlu0 %v3809_v8, %s3739_s0 }
 0x11d   :  { %381 = vrot.lane.b32.xlu1 %v3804_v7, %s3739_s0 }
 0x11f   :  { %387 = vrot.lane.b32.xlu0 %v3823_v10, %s3739_s0 }
 0x121   :  { %385 = vrot.lane.b32.xlu1 %v3818_v9, %s3739_s0 }
 0x125   :  { %389 = vrot.lane.b32.xlu1 %v3832_v11, %s3739_s0 }
 0x182   :  { %v184_v60 = vpop.xlane.xlu0 %183 }
 0x183   :  { %v207_v61 = vmul.f32 0.03125, %v184_v60  ;;  %v3740_v60 = vmov 0.0  }
 0x184   :  { %647 = vmatprep.mubr.f32.mxu0 %v3740_v60 }
 0x185   :  { %v215_v62 = vmax.f32 %v207_v61, 1e-08  ;;  %v193_v63 = vpop.xlane.xlu1 %192  ;;  %v3741_v61 = vmov 0.0|0.0  }
 0x186   :  { %v210_v0 = vmul.f32 0.03125, %v193_v63  ;;  %v187_v1 = vpop.xlane.xlu0 %186 }
 0x187   :  { %3616 = vrcp.f32 %v215_v62  ;;  %v208_v2 = vmul.f32 0.03125, %v187_v1  ;;  %v3911_v62 = vld [vmem:[%s4417_s3 + $0x1] ss:$0 sm:$0xff]  ;;  %v828_v1 = vld [vmem:[#allocation4 + $0x168] sm:$0xff] }
 0x188   :  { %v218_v3 = vmax.f32 %v210_v0, 1e-08  ;;  %v825_v0 = vld [vmem:[#allocation4 + $0x150] sm:$0xff] }
 0x189   :  { %v216_v4 = vmax.f32 %v208_v2, 1e-08  ;;  %v190_v5 = vpop.xlane.xlu1 %189 }
 0x18a   :  { %v209_v6 = vmul.f32 0.03125, %v190_v5  ;;  %v196_v7 = vpop.xlane.xlu0 %195  ;;  %v835_v5 = vld [vmem:[#allocation4 + $0x1a0] sm:$0xff] }
 0x18b   :  { %3618 = vrcp.f32 %v216_v4  ;;  %v211_v8 = vmul.f32 0.03125, %v196_v7  ;;  %v832_v4 = vld [vmem:[#allocation4 + $0x188] sm:$0xff]  ;;  %v827_v7 = vld [vmem:[#allocation4 + $0x160] sm:$0xff] }
 0x18c   :  { %v217_v9 = vmax.f32 %v209_v6, 1e-08  ;;  %3620 = vrcp.f32 %v218_v3 }
 0x18d   :  { %v219_v10 = vmax.f32 %v211_v8, 1e-08  ;;  %v199_v11 = vpop.xlane.xlu1 %198  ;;  %v830_v8 = vld [vmem:[#allocation4 + $0x178] sm:$0xff] }
 0x18e   :  { %3622 = vrcp.f32 %v217_v9  ;;  %v212_v12 = vmul.f32 0.03125, %v199_v11  ;;  %v202_v13 = vpop.xlane.xlu0 %201  ;;  %v3915_v9 = vpack.c.bf16 %v828_v1, %v825_v0  ;;  %v845_v0 = vld [vmem:[#allocation4 + $0x1f0] sm:$0xff]  ;;  %v848_v1 = vld [vmem:[#allocation4 + $0x208] sm:$0xff] }
 0x18f   :  { %3624 = vrcp.f32 %v219_v10  ;;  %v213_v14 = vmul.f32 0.03125, %v202_v13  ;;  %v831_v13 = vld [vmem:[#allocation4 + $0x180] sm:$0xff] }
 0x190   :  { %v220_v17 = vmax.f32 %v212_v12, 1e-08  ;;  %v3917_v12 = vpack.c.bf16 %v835_v5, %v832_v4  ;;  %v858_v4 = vld [vmem:[#allocation4 + $0x258] sm:$0xff] }
 0x191   :  { %v3617_v18 = vpop.eup %3616  ;;  %v221_v20 = vmax.f32 %v213_v14, 1e-08  ;;  %v205_v22 = vpop.xlane.xlu1 %204  ;;  %v834_v14 = vld [vmem:[#allocation4 + $0x198] sm:$0xff] }
 0x192   :  { %3626 = vrcp.f32 %v220_v17  ;;  %v214_v23 = vmul.f32 0.03125, %v205_v22  ;;  %v224_v24 = vmul.f32 %v3617_v18, %v3841_v16  ;;  %v376_v45 = vpop.permute.xlu0 %375  ;;  %v838_v22 = vld [vmem:[#allocation4 + $0x1b8] sm:$0xff] }
 0x193   :  { %3628 = vrcp.f32 %v221_v20  ;;  %v862_v5 = vld [vmem:[#allocation4 + $0x278] sm:$0xff] }
 0x194   :  { %v222_v25 = vmax.f32 %v214_v23, 1e-08  ;;  %2667 = vmatprep.mubr.msk.f32.mxu1 %vm181_vm1, %v224_v24  ;;  %v841_v23 = vld [vmem:[#allocation4 + $0x1d0] sm:$0xff]  ;;  %v3922_v24 = vpack.c.bf16 %v830_v8, %v827_v7  ;;  %v3991_v7 = vpack.c.bf16 %v848_v1, %v845_v0 }
 0x195   :  { %v3619_v27 = vpop.eup %3618  ;;  %v378_v16 = vpop.permute.xlu1 %377 }
 0x196   :  { %v226_v28 = vmul.f32 %v3619_v27, %v3839_v15  ;;  %3630 = vrcp.f32 %v222_v25  ;;  %v3621_v29 = vpop.eup %3620  ;;  %v3929_v27 = vpack.c.bf16 %v834_v14, %v831_v13  ;;  %v861_v14 = vld [vmem:[#allocation4 + $0x270] sm:$0xff] }
 0x197   :  { %v230_v39 = vmul.f32 %v3621_v29, %v3844_v19 }
 0x198   :  { %v3623_v34 = vpop.eup %3622  ;;  %2668 = vmatmul.mubr.msk.f32.vlgmr.msra.gmra.mrb[8].mxu1 %vm181_vm1, %v226_v28 }
 0x199   :  { %v3625_v36 = vpop.eup %3624  ;;  %3056 = vmatpush3.bf16.msra.mxu1 %v3053_v53  ;;  %v228_v37 = vmul.f32 %v3623_v34, %v3846_v21  ;;  %v380_v44 = vpop.permute.xlu1 %379  ;;  %v3063_v53 = vpack.c.bf16 %v538_v52, %v535_v51  ;;  %v842_v51 = vld [vmem:[#allocation4 + $0x1d8] sm:$0xff] }
 0x19a   :  { %v232_v40 = vmul.f32 %v3625_v36, %v3855_v30  ;;  %2683 = vmatprep.subr.mxu1 %v241_v31 }
 0x19b   :  { %2670 = vmatprep.mubr.msk.f32.mxu1 %vm181_vm1, %v228_v37  ;;  %3064 = vmatpush1.bf16.msra.mxu0 %v3063_v53 }
 0x19c   :  { %v3627_v15 = vpop.eup %3626  ;;  %2671 = vmatmul.mubr.msk.f32.gmra.mrb[10].mxu1 %vm181_vm1, %v230_v39  ;;  %3074 = vmatprep.subr.bf16.mxu0 %v3903_v59  ;;  %v847_v39 = vld [vmem:[#allocation4 + $0x200] sm:$0xff] }
 0x19d   :  { %v3629_v42 = vpop.eup %3628  ;;  %2673 = vmatprep.mubr.msk.f32.mxu1 %vm181_vm1, %v232_v40  ;;  %v234_v43 = vmul.f32 %v3627_v15, %v3851_v26  ;;  %2684 = vmatpush3.msra.mxu1 %v241_v31  ;;  %v382_v46 = vpop.permute.xlu1 %381  ;;  %v3933_v31 = vpack.c.bf16 %v841_v23, %v838_v22  ;;  %v836_v15 = vld [vmem:[#allocation4 + $0x1a8] sm:$0xff] }
 0x19e   :  { %v236_v21 = vmul.f32 %v3629_v42, %v3863_v38  ;;  %3066 = vmatprep.subr.bf16.mxu1 %v3065_v41  ;;  %v384_v26 = vpop.permute.xlu0 %383  ;;  %v3945_v42 = vpack.c.bf16 %v840_v33, %v837_v32  ;;  %v867_v32 = vld [vmem:[#allocation4 + $0x2a0] sm:$0xff]  ;;  %v870_v33 = vld [vmem:[#allocation4 + $0x2b8] sm:$0xff] }
 0x1a0   :  { %v3631_v19 = vpop.eup %3630  ;;  %2674 = vmatmul.mubr.msk.f32.gmra.mrb[12].mxu1 %vm181_vm1, %v234_v43 }
 0x1a1   :  { %2676 = vmatprep.mubr.msk.f32.mxu1 %vm181_vm1, %v236_v21  ;;  %v238_v30 = vmul.f32 %v3631_v19, %v3860_v35  ;;  %v386_v38 = vpop.permute.xlu1 %385  ;;  %v843_v19 = vld [vmem:[#allocation4 + $0x1e0] sm:$0xff] }
 0x1a2   :  { %v388_v47 = vpop.permute.xlu0 %387 }
 0x1a4   :  { %2677 = vmatmul.mubr.msk.f32.gmra.mrb[14].mxu1 %vm181_vm1, %v238_v30  ;;  %v846_v30 = vld [vmem:[#allocation4 + $0x1f8] sm:$0xff] }
 0x1a5   :  { %2685 = vmatprep.mubr.msk.f32.mxu1 %vm43_vm0, %v376_v45  ;;  %v390_v35 = vpop.permute.xlu1 %389  ;;  %v3965_v49 = vpack.c.bf16 %v846_v30, %v843_v19 }
 0x1a8   :  { %2686 = vmatmul.mubr.msk.f32.vlgmr.msra.gmra.mrb[8].mxu1 %vm43_vm0, %v378_v16  ;;  %v844_v16 = vld [vmem:[#allocation4 + $0x1e8] sm:$0xff] }
 0x1a9   :  { %2688 = vmatprep.mubr.msk.f32.mxu1 %vm43_vm0, %v380_v44  ;;  %3068 = vmatpush3.bf16.msra.mxu1 %v3065_v41  ;;  %v833_v41 = vld [vmem:[#allocation4 + $0x190] sm:$0xff]  ;;  %v3949_v44 = vpack.c.bf16 %v847_v39, %v844_v16  ;;  %v866_v16 = vld [vmem:[#allocation4 + $0x298] sm:$0xff] }
 0x1aa   :  { %3070 = vmatprep.subr.bf16.mxu1 %v3069_v56 }
 0x1ac   :  { %2689 = vmatmul.mubr.msk.f32.gmra.mrb[10].mxu1 %vm43_vm0, %v382_v46 }
 0x1ad   :  { %2691 = vmatprep.mubr.msk.f32.mxu1 %vm43_vm0, %v384_v26  ;;  %3072 = vmatpush3.bf16.msra.mxu1 %v3069_v56 }
 0x1ae   :  { %3105 = vmatprep.subr.bf16.mxu1 %v3741_v61 }
 0x1b0   :  { %2692 = vmatmul.mubr.msk.f32.gmra.mrb[12].mxu1 %vm43_vm0, %v386_v38  ;;  %v850_v38 = vld [vmem:[#allocation4 + $0x218] sm:$0xff] }
 0x1b1   :  { %2694 = vmatprep.mubr.msk.f32.mxu1 %vm43_vm0, %v388_v47  ;;  %v853_v47 = vld [vmem:[#allocation4 + $0x230] sm:$0xff] }
 0x1b2   :  { %v3970_v53 = vpack.c.bf16 %v853_v47, %v850_v38 }
 0x1b4   :  { %2695 = vmatmul.mubr.msk.f32.gmra.mrb[14].mxu1 %vm43_vm0, %v390_v35  ;;  %v3956_v35 = vpack.c.bf16 %v836_v15, %v833_v41  ;;  %v869_v41 = vld [vmem:[#allocation4 + $0x2b0] sm:$0xff]  ;;  %v872_v15 = vld [vmem:[#allocation4 + $0x2c8] sm:$0xff] }
 0x27b   :  { %v2687_v63 = vpop.f32.mrb[8].mxu1 }
 0x27c   :  { %v514_v2 = vadd.f32 %v2687_v63, %v3911_v62  ;;  %v473_v3 = vpop.f32.mrb[9].mxu1  ;;  %v3980_v63 = vpack.c.bf16 %v852_v55, %v849_v54 }
 0x27d   :  { %v513_v6 = vadd.f32 %v3911_v62, %v473_v3  ;;  %v855_v3 = vld [vmem:[#allocation4 + $0x240] sm:$0xff] }
 0x27e   :  { %v522_v17 = vmax.f32 %v514_v2, 0.0  ;;  %v3984_v2 = vpack.c.bf16 %v859_v58, %v856_v57  ;;  %v3995_v8 = vpack.c.bf16 %v858_v4, %v855_v3 }
 0x27f   :  { %v521_v10 = vmax.f32 %v513_v6, 0.0  ;;  %v2690_v11 = vpop.f32.mrb[10].mxu1  ;;  %v865_v6 = vld [vmem:[#allocation4 + $0x290] sm:$0xff] }
 0x280   :  { %v3920_v18 = vadd.f32 %v2690_v11, %v3911_v62  ;;  %v483_v20 = vpop.f32.mrb[11].mxu1  ;;  %v854_v11 = vld [vmem:[#allocation4 + $0x238] sm:$0xff]  ;;  %v3998_v13 = vpack.c.bf16 %v865_v6, %v862_v5  ;;  %v2418_v5 = vld [vmem:[%s4417_s3 + $0x3] ss:$8 sm:$0x7] }
 0x281   :  { %v515_v25 = vadd.f32 %v3911_v62, %v483_v20  ;;  %2402 = vmatmul.mubr.msk.f32.vlgmr.msra.gmra.mrb[0].mxu0 %vm181_vm1, %v521_v10  ;;  %2705 = vmatprep.mubr.msk.f32.mxu1 %vm181_vm1, %v521_v10  ;;  %v851_v10 = vld [vmem:[#allocation4 + $0x220] sm:$0xff] }
 0x282   :  { %3076 = vmatpush1.bf16.msra.mxu0 %v3915_v9  ;;  %2706 = vmatmul.mubr.msk.f32.vlgmr.msra.gmra.mrb[16].mxu1 %vm181_vm1, %v522_v17  ;;  %v524_v34 = vmax.f32 %v3920_v18, 0.0  ;;  %v868_v18 = vld [vmem:[#allocation4 + $0x2a8] sm:$0xff]  ;;  %v871_v20 = vld [vmem:[#allocation4 + $0x2c0] sm:$0xff]  ;;  %v4003_v22 = vpack.c.bf16 %v854_v11, %v851_v10 }
 0x283   :  { %v523_v28 = vmax.f32 %v515_v25, 0.0  ;;  %v2693_v29 = vpop.f32.mrb[12].mxu1  ;;  %653 = vmatprep.mubr.f32.mxu0 %v3740_v60  ;;  %3078 = vmatprep.subr.bf16.mxu0 %v3917_v12  ;;  %v857_v25 = vld [vmem:[#allocation4 + $0x250] sm:$0xff] }
 0x284   :  { %v3937_v36 = vadd.f32 %v2693_v29, %v3911_v62  ;;  %v493_v37 = vpop.f32.mrb[13].mxu1  ;;  %3107 = vmatpush3.bf16.msra.mxu1 %v3922_v24  ;;  %v4010_v29 = vpack.c.bf16 %v871_v20, %v868_v18 }
 0x285   :  { %v517_v40 = vadd.f32 %v3911_v62, %v493_v37  ;;  %2403 = vmatmul.mubr.msk.f32.gmra.mrb[2].mxu0 %vm181_vm1, %v522_v17  ;;  %2708 = vmatprep.mubr.msk.f32.mxu1 %vm181_vm1, %v523_v28  ;;  %v864_v17 = vld [vmem:[#allocation4 + $0x288] sm:$0xff]  ;;  %v863_v37 = vld [vmem:[#allocation4 + $0x280] sm:$0xff] }
 0x286   :  { %3080 = vmatpush1.bf16.msra.mxu0 %v3929_v27  ;;  %2709 = vmatmul.mubr.msk.f32.gmra.mrb[18].mxu1 %vm181_vm1, %v524_v34  ;;  %v526_v45 = vmax.f32 %v3937_v36, 0.0  ;;  %v4007_v23 = vpack.c.bf16 %v864_v17, %v861_v14  ;;  %v4019_v36 = vpack.c.bf16 %v870_v33, %v867_v32  ;;  %v4025_v39 = vpack.c.bf16 %v866_v16, %v863_v37 }
 0x287   :  { %v525_v43 = vmax.f32 %v517_v40, 0.0  ;;  %v2696_v21 = vpop.f32.mrb[14].mxu1  ;;  %659 = vmatprep.mubr.f32.mxu0 %v3740_v60  ;;  %3082 = vmatprep.subr.bf16.mxu0 %v3933_v31  ;;  %v4032_v40 = vld [vmem:[%s4415_s1] sm:$0xff] }
 0x288   :  { %v3953_v46 = vadd.f32 %v2696_v21, %v3911_v62  ;;  %v503_v26 = vpop.f32.mrb[15].mxu1  ;;  %3108 = vmatprep.subr.bf16.mxu1 %v3741_v61  ;;  %v544_v21 = vlaneseq }
 0x289   :  { %v3959_v48 = vadd.f32 %v3911_v62, %v503_v26  ;;  %2404 = vmatmul.mubr.msk.f32.gmra.mrb[4].mxu0 %vm181_vm1, %v523_v28  ;;  %2711 = vmatprep.mubr.msk.f32.mxu1 %vm181_vm1, %v525_v43  ;;  %v3976_v62 = vpack.c.bf16 %v842_v51, %v839_v50  ;;  %v860_v28 = vld [vmem:[#allocation4 + $0x268] sm:$0xff] }
 0x28a   :  { %3084 = vmatpush1.bf16.msra.mxu0 %v3945_v42  ;;  %2712 = vmatmul.mubr.msk.f32.gmra.mrb[20].mxu1 %vm181_vm1, %v526_v45  ;;  %v528_v56 = vmax.f32 %v3953_v46, 0.0  ;;  %v545_v19 = vshrl.u32 %v544_v21, 7 }
 0x28b   :  { %v527_v52 = vmax.f32 %v3959_v48, 0.0  ;;  %665 = vmatprep.mubr.f32.mxu0 %v3740_v60  ;;  %3086 = vmatprep.subr.bf16.mxu0 %v3949_v44 }
 0x28c   :  { %3110 = vmatpush3.bf16.msra.mxu1 %v3956_v35  ;;  %v554_v30 = vsub.s32 2, %v545_v19  ;;  %v546_v4 = vsub.s32 0, %v545_v19  ;;  %v550_v6 = vsub.s32 1, %v545_v19 }
 0x28d   :  { %2405 = vmatmul.mubr.msk.f32.gmra.mrb[6].mxu0 %vm181_vm1, %v524_v34  ;;  %2714 = vmatprep.mubr.msk.f32.mxu1 %vm181_vm1, %v527_v52  ;;  %v4015_v34 = vpack.c.bf16 %v860_v28, %v857_v25 }
 0x28e   :  { %3088 = vmatpush1.bf16.msra.mxu0 %v3965_v49  ;;  %2715 = vmatmul.mubr.msk.f32.gmra.mrb[22].mxu1 %vm181_vm1, %v528_v56  ;;  %v883_v11 = vrot.slane %v2418_v5, %v546_v4  ;;  %v887_v17 = vrot.slane %v2418_v5, %v550_v6 }
 0x28f   :  { %671 = vmatprep.mubr.f32.mxu0 %v3740_v60  ;;  %3090 = vmatprep.subr.bf16.mxu0 %v3970_v53 }
 0x290   :  { %3111 = vmatprep.subr.bf16.mxu1 %v3741_v61  ;;  %2749 = vmatprep.mubr.msk.f32.mxu1 %vm3742_vm2, %v3740_v60 }
 0x291   :  { %2406 = vmatmul.mubr.msk.f32.gmra.mrb[8].mxu0 %vm181_vm1, %v525_v43  ;;  %3113 = vmatpush3.bf16.msra.mxu1 %v3976_v62  ;;  %v4038_v43 = vpack.c.bf16 %v872_v15, %v869_v41 }
 0x292   :  { %3092 = vmatpush1.bf16.msra.mxu0 %v3980_v63  ;;  %677 = vmatprep.mubr.f32.mxu0 %v3740_v60 }
 0x293   :  { %3094 = vmatprep.subr.bf16.mxu0 %v3984_v2  ;;  %3114 = vmatprep.subr.bf16.mxu1 %v3741_v61 }
 0x295   :  { %2407 = vmatmul.mubr.msk.f32.gmra.mrb[10].mxu0 %vm181_vm1, %v526_v45  ;;  %3116 = vmatpush3.bf16.msra.mxu1 %v3991_v7  ;;  %v2401_v45 = vld [vmem:[%s4417_s3 + $0x2] ss:$8 sm:$0x7] }
 0x296   :  { %3096 = vmatpush1.bf16.msra.mxu0 %v3995_v8  ;;  %683 = vmatprep.mubr.f32.mxu0 %v3740_v60  ;;  %v555_v46 = vrot.slane %v2401_v45, %v554_v30  ;;  %v547_v10 = vrot.slane %v2401_v45, %v546_v4  ;;  %v551_v14 = vrot.slane %v2401_v45, %v550_v6 }
 0x297   :  { %3098 = vmatprep.subr.bf16.mxu0 %v3998_v13  ;;  %3117 = vmatprep.subr.bf16.mxu1 %v3741_v61  ;;  %v4105_v45 = vrot.slane %v2418_v5, %v554_v30 }
 0x298   :  { %v4099_v18 = vadd.f32 %v883_v11, %v547_v10  ;;  %v4101_v25 = vadd.f32 %v887_v17, %v551_v14 }
 0x299   :  { %2408 = vmatmul.mubr.msk.f32.gmra.mrb[12].mxu0 %vm181_vm1, %v527_v52  ;;  %3119 = vmatpush3.bf16.msra.mxu1 %v4003_v22 }
 0x29a   :  { %3100 = vmatpush1.bf16.msra.mxu0 %v4007_v23  ;;  %689 = vmatprep.mubr.f32.mxu0 %v3740_v60 }
 0x29b   :  { %3102 = vmatprep.subr.bf16.mxu0 %v4010_v29  ;;  %3120 = vmatprep.subr.bf16.mxu1 %v3741_v61 }
 0x29d   :  { %2409 = vmatmul.mubr.msk.f32.gmra.mrb[14].mxu0 %vm181_vm1, %v528_v56  ;;  %3122 = vmatpush3.bf16.msra.mxu1 %v4015_v34 }
 0x29e   :  { %3104 = vmatpush1.bf16.msra.mxu0 %v4019_v36  ;;  %959 = vmatprep.mubr.f32.mxu0 %v3740_v60 }
 0x29f   :  { %3123 = vmatprep.subr.bf16.mxu1 %v3741_v61  ;;  %3130 = vmatprep.subr.bf16.mxu0 %v3903_v59 }
 0x2a1   :  { %960 = vmatmul.mubr.f32.vlgmr.msra.gmra.mrb[0].mxu0 %v4032_v40  ;;  %3125 = vmatpush3.bf16.msra.mxu1 %v4025_v39 }
 0x2a2   :  { %3126 = vmatprep.subr.bf16.mxu1 %v3741_v61  ;;  %3132 = vmatpush1.bf16.msra.mxu0 %v3915_v9 }
 0x2a3   :  { %3134 = vmatprep.subr.bf16.mxu0 %v3917_v12  ;;  %1126 = vmatprep.mubr.f32.mxu0 %v3740_v60 }
 0x2a5   :  { %3128 = vmatpush3.bf16.msra.mxu1 %v4038_v43 }
 0x2a6   :  { %3161 = vmatprep.subr.bf16.mxu1 %v3741_v61  ;;  %3136 = vmatpush1.bf16.msra.mxu0 %v3929_v27 }
 0x2a7   :  { %3138 = vmatprep.subr.bf16.mxu0 %v3933_v31 }
 0x2a8   :  { %2750 = vmatmul.mubr.f32.vlgmr.msra.gmra.mrb[24].mxu1 %v4032_v40 }
 0x2a9   :  { %3163 = vmatpush3.bf16.msra.mxu1 %v3922_v24  ;;  %2784 = vmatprep.mubr.msk.f32.mxu1 %vm3742_vm2, %v3740_v60 }
 0x2aa   :  { %3164 = vmatprep.subr.bf16.mxu1 %v3741_v61  ;;  %3140 = vmatpush1.bf16.msra.mxu0 %v3945_v42 }
 0x2ab   :  { %3142 = vmatprep.subr.bf16.mxu0 %v3949_v44 }
 0x2ad   :  { %3166 = vmatpush3.bf16.msra.mxu1 %v3956_v35 }
 0x2ae   :  { %3167 = vmatprep.subr.bf16.mxu1 %v3741_v61  ;;  %3144 = vmatpush1.bf16.msra.mxu0 %v3965_v49 }
 0x2af   :  { %3146 = vmatprep.subr.bf16.mxu0 %v3970_v53 }
 0x2b1   :  { %3169 = vmatpush3.bf16.msra.mxu1 %v3976_v62 }
 0x2b2   :  { %3170 = vmatprep.subr.bf16.mxu1 %v3741_v61  ;;  %3148 = vmatpush1.bf16.msra.mxu0 %v3980_v63 }
 0x2b3   :  { %3150 = vmatprep.subr.bf16.mxu0 %v3984_v2 }
 0x2b5   :  { %3172 = vmatpush3.bf16.msra.mxu1 %v3991_v7 }
 0x2b6   :  { %3173 = vmatprep.subr.bf16.mxu1 %v3741_v61  ;;  %3152 = vmatpush1.bf16.msra.mxu0 %v3995_v8 }
 0x2b7   :  { %3154 = vmatprep.subr.bf16.mxu0 %v3998_v13 }
 0x2b9   :  { %3175 = vmatpush3.bf16.msra.mxu1 %v4003_v22 }
 0x2ba   :  { %3176 = vmatprep.subr.bf16.mxu1 %v3741_v61  ;;  %3156 = vmatpush1.bf16.msra.mxu0 %v4007_v23 }
 0x2bb   :  { %3158 = vmatprep.subr.bf16.mxu0 %v4010_v29 }
 0x2bd   :  { %3178 = vmatpush3.bf16.msra.mxu1 %v4015_v34 }
 0x2be   :  { %3179 = vmatprep.subr.bf16.mxu1 %v3741_v61  ;;  %3160 = vmatpush1.bf16.msra.mxu0 %v4019_v36 }
 0x2bf   :  { %3186 = vmatprep.subr.bf16.mxu0 %v3903_v59 }
 0x2c1   :  { %3181 = vmatpush3.bf16.msra.mxu1 %v4025_v39 }
 0x2c2   :  { %3182 = vmatprep.subr.bf16.mxu1 %v3741_v61 }
 0x2c5   :  { %3184 = vmatpush3.bf16.msra.mxu1 %v4038_v43 }
 0x2c6   :  { %3217 = vmatprep.subr.bf16.mxu1 %v3741_v61 }
 0x355   :  { %v2707_v26 = vpop.f32.mrb[16].mxu1 }
 0x356   :  { %v4082_v38 = vadd.f32 %v2707_v26, %v555_v46  ;;  %v762_v47 = vpop.f32.mrb[17].mxu1 }
 0x359   :  { %v2710_v48 = vpop.f32.mrb[18].mxu1 }
 0x35a   :  { %v4084_v50 = vadd.f32 %v2710_v48, %v555_v46  ;;  %v772_v51 = vpop.f32.mrb[19].mxu1 }
 0x35b   :  { %v4086_v52 = vadd.f32 %v772_v51, %v555_v46 }
 0x35d   :  { %v2713_v54 = vpop.f32.mrb[20].mxu1 }
 0x35e   :  { %v4088_v55 = vadd.f32 %v2713_v54, %v555_v46  ;;  %v782_v56 = vpop.f32.mrb[21].mxu1 }
 0x35f   :  { %v4090_v57 = vadd.f32 %v782_v56, %v555_v46  ;;  %v763_v56 = vadd.f32 %v762_v47, %v555_v46 }
 0x361   :  { %v2716_v58 = vpop.f32.mrb[22].mxu1 }
 0x362   :  { %v4092_v0 = vadd.f32 %v2716_v58, %v555_v46  ;;  %v792_v1 = vpop.f32.mrb[23].mxu1 }
 0x363   :  { %v4094_v3 = vadd.f32 %v792_v1, %v555_v46 }
 0x374   :  { %v961_v20 = vpop.f32.mrb[0].mxu0 }
 0x375   :  { %v3554_v28 = vadd.f32 %v4099_v18, %v961_v20  ;;  %v963_v32 = vpop.f32.mrb[1].mxu0 }
 0x376   :  { %v3556_v37 = vadd.f32 %v4101_v25, %v963_v32 }
 0x377   :  { %v2419_v33 = vmul.f32 -1.442695, %v3554_v28 }
 0x378   :  { %v2420_v41 = vmul.f32 -1.442695, %v3556_v37 }
 0x379   :  { %3632 = vpow2.f32 %v2419_v33 }
 0x37a   :  { %3634 = vpow2.f32 %v2420_v41 }
 0x37b   :  { %v1032_v16 = vpop.f32.mrb[24].mxu1 }
 0x37c   :  { %v2751_v15 = vpop.f32.mrb[25].mxu1  ;;  %v1033_v51 = vadd.f32 %v1032_v16, %v4105_v45 }
 0x383   :  { %v3633_v21 = vpop.eup %3632 }
 0x384   :  { %v1040_v19 = vadd.f32 1.0, %v3633_v21  ;;  %v3635_v26 = vpop.eup %3634 }
 0x385   :  { %v1047_v48 = vadd.f32 1.0, %v3635_v26 }
 0x386   :  { %3636 = vrcp.f32 %v1040_v19 }
 0x387   :  { %3638 = vrcp.f32 %v1047_v48 }
 0x390   :  { %v3637_v54 = vpop.eup %3636 }
 0x391   :  { %v1050_v58 = vmul.f32 %v3637_v54, %v1033_v51  ;;  %v3639_v4 = vpop.eup %3638 }
 0x392   :  { %v1053_v6 = vsub.f32 1.0, %v3639_v4  ;;  %v1055_v14 = vmul.f32 %v3639_v4, %v4032_v40 }
 0x393   :  { %v1051_v1 = vadd.f32 %v1050_v58, %v763_v56 }
 0x395   :  { %3640 = vtanh.f32 %v1051_v1 }
 0x39f   :  { %v3641_v10 = vpop.eup %3640 }
 0x3a0   :  { %v1054_v11 = vmul.f32 %v3641_v10, %v1053_v6 }
 0x3a2   :  { %v4109_v17 = vadd.f32 %v1055_v14, %v1054_v11 }
 0x3a4   :  { %1127 = vmatmul.mubr.f32.vlgmr.msra.gmra.mrb[2].mxu0 %v4109_v17  ;;  %2785 = vmatmul.mubr.f32.vlgmr.msra.gmra.mrb[26].mxu1 %v4109_v17 }
 0x3a5   :  { %3188 = vmatpush1.bf16.msra.mxu0 %v3915_v9  ;;  %3219 = vmatpush3.bf16.msra.mxu1 %v3922_v24 }
 0x3a6   :  { %3190 = vmatprep.subr.bf16.mxu0 %v3917_v12  ;;  %3220 = vmatprep.subr.bf16.mxu1 %v3741_v61 }
 0x3a7   :  { %1294 = vmatprep.mubr.f32.mxu0 %v3740_v60  ;;  %2819 = vmatprep.mubr.msk.f32.mxu1 %vm3742_vm2, %v3740_v60 }
 0x3a9   :  { %3192 = vmatpush1.bf16.msra.mxu0 %v3929_v27  ;;  %3222 = vmatpush3.bf16.msra.mxu1 %v3956_v35 }
 0x3aa   :  { %3194 = vmatprep.subr.bf16.mxu0 %v3933_v31  ;;  %3223 = vmatprep.subr.bf16.mxu1 %v3741_v61 }
 0x3ad   :  { %3196 = vmatpush1.bf16.msra.mxu0 %v3945_v42  ;;  %3225 = vmatpush3.bf16.msra.mxu1 %v3976_v62 }
 0x3ae   :  { %3198 = vmatprep.subr.bf16.mxu0 %v3949_v44  ;;  %3226 = vmatprep.subr.bf16.mxu1 %v3741_v61 }
 0x3b1   :  { %3200 = vmatpush1.bf16.msra.mxu0 %v3965_v49  ;;  %3228 = vmatpush3.bf16.msra.mxu1 %v3991_v7 }
 0x3b2   :  { %3202 = vmatprep.subr.bf16.mxu0 %v3970_v53  ;;  %3229 = vmatprep.subr.bf16.mxu1 %v3741_v61 }
 0x3b5   :  { %3204 = vmatpush1.bf16.msra.mxu0 %v3980_v63  ;;  %3231 = vmatpush3.bf16.msra.mxu1 %v4003_v22 }
 0x3b6   :  { %3206 = vmatprep.subr.bf16.mxu0 %v3984_v2  ;;  %3232 = vmatprep.subr.bf16.mxu1 %v3741_v61 }
 0x3b9   :  { %3208 = vmatpush1.bf16.msra.mxu0 %v3995_v8  ;;  %3234 = vmatpush3.bf16.msra.mxu1 %v4015_v34 }
 0x3ba   :  { %3210 = vmatprep.subr.bf16.mxu0 %v3998_v13  ;;  %3235 = vmatprep.subr.bf16.mxu1 %v3741_v61 }
 0x3bd   :  { %3212 = vmatpush1.bf16.msra.mxu0 %v4007_v23  ;;  %3237 = vmatpush3.bf16.msra.mxu1 %v4025_v39 }
 0x3be   :  { %3214 = vmatprep.subr.bf16.mxu0 %v4010_v29  ;;  %3238 = vmatprep.subr.bf16.mxu1 %v3741_v61 }
 0x3c1   :  { %3216 = vmatpush1.bf16.msra.mxu0 %v4019_v36  ;;  %3240 = vmatpush3.bf16.msra.mxu1 %v4038_v43 }
 0x3c2   :  { %3242 = vmatprep.subr.bf16.mxu0 %v3903_v59  ;;  %3273 = vmatprep.subr.bf16.mxu1 %v3741_v61 }
 0x477   :  { %v1128_v40 = vpop.f32.mrb[2].mxu0  ;;  %v1199_v30 = vpop.f32.mrb[26].mxu1 }
 0x478   :  { %v3558_v46 = vadd.f32 %v4099_v18, %v1128_v40  ;;  %v1130_v47 = vpop.f32.mrb[3].mxu0  ;;  %v2786_v5 = vpop.f32.mrb[27].mxu1  ;;  %v1200_v15 = vadd.f32 %v1199_v30, %v4105_v45 }
 0x479   :  { %v3560_v28 = vadd.f32 %v4101_v25, %v1130_v47 }
 0x47a   :  { %v2421_v20 = vmul.f32 -1.442695, %v3558_v46 }
 0x47b   :  { %v2422_v32 = vmul.f32 -1.442695, %v3560_v28 }
 0x47c   :  { %3642 = vpow2.f32 %v2421_v20 }
 0x47d   :  { %3644 = vpow2.f32 %v2422_v32 }
 0x486   :  { %v3643_v33 = vpop.eup %3642 }
 0x487   :  { %v1207_v37 = vadd.f32 1.0, %v3643_v33  ;;  %v3645_v16 = vpop.eup %3644 }
 0x488   :  { %v1214_v41 = vadd.f32 1.0, %v3645_v16 }
 0x489   :  { %3646 = vrcp.f32 %v1207_v37 }
 0x48a   :  { %3648 = vrcp.f32 %v1214_v41 }
 0x493   :  { %v3647_v21 = vpop.eup %3646 }
 0x494   :  { %v1217_v19 = vmul.f32 %v3647_v21, %v1200_v15  ;;  %v3649_v48 = vpop.eup %3648 }
 0x495   :  { %v1220_v51 = vsub.f32 1.0, %v3649_v48  ;;  %v1222_v58 = vmul.f32 %v3649_v48, %v4109_v17 }
 0x496   :  { %v1218_v26 = vadd.f32 %v1217_v19, %v4082_v38 }
 0x498   :  { %3650 = vtanh.f32 %v1218_v26 }
 0x4a2   :  { %v3651_v54 = vpop.eup %3650 }
 0x4a3   :  { %v1221_v56 = vmul.f32 %v3651_v54, %v1220_v51 }
 0x4a5   :  { %v4153_v1 = vadd.f32 %v1222_v58, %v1221_v56 }
 0x4a7   :  { %1295 = vmatmul.mubr.f32.vlgmr.msra.gmra.mrb[4].mxu0 %v4153_v1  ;;  %2820 = vmatmul.mubr.f32.vlgmr.msra.gmra.mrb[28].mxu1 %v4153_v1 }
 0x4a8   :  { %3244 = vmatpush1.bf16.msra.mxu0 %v3915_v9  ;;  %3275 = vmatpush3.bf16.msra.mxu1 %v3922_v24 }
 0x4a9   :  { %3246 = vmatprep.subr.bf16.mxu0 %v3917_v12  ;;  %3276 = vmatprep.subr.bf16.mxu1 %v3741_v61 }
 0x4aa   :  { %1462 = vmatprep.mubr.f32.mxu0 %v3740_v60  ;;  %2854 = vmatprep.mubr.msk.f32.mxu1 %vm3742_vm2, %v3740_v60 }
 0x4ac   :  { %3248 = vmatpush1.bf16.msra.mxu0 %v3929_v27  ;;  %3278 = vmatpush3.bf16.msra.mxu1 %v3956_v35 }
 0x4ad   :  { %3250 = vmatprep.subr.bf16.mxu0 %v3933_v31  ;;  %3279 = vmatprep.subr.bf16.mxu1 %v3741_v61 }
 0x4b0   :  { %3252 = vmatpush1.bf16.msra.mxu0 %v3945_v42  ;;  %3281 = vmatpush3.bf16.msra.mxu1 %v3976_v62 }
 0x4b1   :  { %3254 = vmatprep.subr.bf16.mxu0 %v3949_v44  ;;  %3282 = vmatprep.subr.bf16.mxu1 %v3741_v61 }
 0x4b4   :  { %3256 = vmatpush1.bf16.msra.mxu0 %v3965_v49  ;;  %3284 = vmatpush3.bf16.msra.mxu1 %v3991_v7 }
 0x4b5   :  { %3258 = vmatprep.subr.bf16.mxu0 %v3970_v53  ;;  %3285 = vmatprep.subr.bf16.mxu1 %v3741_v61 }
 0x4b8   :  { %3260 = vmatpush1.bf16.msra.mxu0 %v3980_v63  ;;  %3287 = vmatpush3.bf16.msra.mxu1 %v4003_v22 }
 0x4b9   :  { %3262 = vmatprep.subr.bf16.mxu0 %v3984_v2  ;;  %3288 = vmatprep.subr.bf16.mxu1 %v3741_v61 }
 0x4bc   :  { %3264 = vmatpush1.bf16.msra.mxu0 %v3995_v8  ;;  %3290 = vmatpush3.bf16.msra.mxu1 %v4015_v34 }
 0x4bd   :  { %3266 = vmatprep.subr.bf16.mxu0 %v3998_v13  ;;  %3291 = vmatprep.subr.bf16.mxu1 %v3741_v61 }
 0x4c0   :  { %3268 = vmatpush1.bf16.msra.mxu0 %v4007_v23  ;;  %3293 = vmatpush3.bf16.msra.mxu1 %v4025_v39 }
 0x4c1   :  { %3270 = vmatprep.subr.bf16.mxu0 %v4010_v29  ;;  %3294 = vmatprep.subr.bf16.mxu1 %v3741_v61 }
 0x4c4   :  { %3272 = vmatpush1.bf16.msra.mxu0 %v4019_v36  ;;  %3296 = vmatpush3.bf16.msra.mxu1 %v4038_v43 }
 0x4c5   :  { %3298 = vmatprep.subr.bf16.mxu0 %v3903_v59  ;;  %3329 = vmatprep.subr.bf16.mxu1 %v3741_v61 }
 0x57a   :  { %v1296_v38 = vpop.f32.mrb[4].mxu0  ;;  %v1367_v4 = vpop.f32.mrb[28].mxu1 }
 0x57b   :  { %v3562_v6 = vadd.f32 %v4099_v18, %v1296_v38  ;;  %v1298_v10 = vpop.f32.mrb[5].mxu0  ;;  %v2821_v11 = vpop.f32.mrb[29].mxu1  ;;  %v1368_v28 = vadd.f32 %v1367_v4, %v4105_v45 }
 0x57c   :  { %v3564_v40 = vadd.f32 %v4101_v25, %v1298_v10 }
 0x57d   :  { %v2423_v14 = vmul.f32 -1.442695, %v3562_v6 }
 0x57e   :  { %v2424_v30 = vmul.f32 -1.442695, %v3564_v40 }
 0x57f   :  { %3652 = vpow2.f32 %v2423_v14 }
 0x580   :  { %3654 = vpow2.f32 %v2424_v30 }
 0x589   :  { %v3653_v46 = vpop.eup %3652 }
 0x58a   :  { %v1375_v47 = vadd.f32 1.0, %v3653_v46  ;;  %v3655_v5 = vpop.eup %3654 }
 0x58b   :  { %v1382_v20 = vadd.f32 1.0, %v3655_v5 }
 0x58c   :  { %3656 = vrcp.f32 %v1375_v47 }
 0x58d   :  { %3658 = vrcp.f32 %v1382_v20 }
 0x596   :  { %v3657_v32 = vpop.eup %3656 }
 0x597   :  { %v1385_v33 = vmul.f32 %v3657_v32, %v1368_v28  ;;  %v3659_v16 = vpop.eup %3658 }
 0x598   :  { %v1388_v41 = vsub.f32 1.0, %v3659_v16  ;;  %v1390_v19 = vmul.f32 %v3659_v16, %v4153_v1 }
 0x599   :  { %v1386_v37 = vadd.f32 %v1385_v33, %v4086_v52 }
 0x59b   :  { %3660 = vtanh.f32 %v1386_v37 }
 0x5a5   :  { %v3661_v15 = vpop.eup %3660 }
 0x5a6   :  { %v1389_v21 = vmul.f32 %v3661_v15, %v1388_v41 }
 0x5a8   :  { %v4197_v26 = vadd.f32 %v1390_v19, %v1389_v21 }
 0x5aa   :  { %1463 = vmatmul.mubr.f32.vlgmr.msra.gmra.mrb[6].mxu0 %v4197_v26  ;;  %2855 = vmatmul.mubr.f32.vlgmr.msra.gmra.mrb[30].mxu1 %v4197_v26 }
 0x5ab   :  { %3300 = vmatpush1.bf16.msra.mxu0 %v3915_v9  ;;  %3331 = vmatpush3.bf16.msra.mxu1 %v3922_v24 }
 0x5ac   :  { %3302 = vmatprep.subr.bf16.mxu0 %v3917_v12  ;;  %3332 = vmatprep.subr.bf16.mxu1 %v3741_v61 }
 0x5ad   :  { %1630 = vmatprep.mubr.f32.mxu0 %v3740_v60  ;;  %2889 = vmatprep.mubr.msk.f32.mxu1 %vm3742_vm2, %v3740_v60 }
 0x5af   :  { %3304 = vmatpush1.bf16.msra.mxu0 %v3929_v27  ;;  %3334 = vmatpush3.bf16.msra.mxu1 %v3956_v35 }
 0x5b0   :  { %3306 = vmatprep.subr.bf16.mxu0 %v3933_v31  ;;  %3335 = vmatprep.subr.bf16.mxu1 %v3741_v61 }
 0x5b3   :  { %3308 = vmatpush1.bf16.msra.mxu0 %v3945_v42  ;;  %3337 = vmatpush3.bf16.msra.mxu1 %v3976_v62 }
 0x5b4   :  { %3310 = vmatprep.subr.bf16.mxu0 %v3949_v44  ;;  %3338 = vmatprep.subr.bf16.mxu1 %v3741_v61 }
 0x5b7   :  { %3312 = vmatpush1.bf16.msra.mxu0 %v3965_v49  ;;  %3340 = vmatpush3.bf16.msra.mxu1 %v3991_v7 }
 0x5b8   :  { %3314 = vmatprep.subr.bf16.mxu0 %v3970_v53  ;;  %3341 = vmatprep.subr.bf16.mxu1 %v3741_v61 }
 0x5bb   :  { %3316 = vmatpush1.bf16.msra.mxu0 %v3980_v63  ;;  %3343 = vmatpush3.bf16.msra.mxu1 %v4003_v22 }
 0x5bc   :  { %3318 = vmatprep.subr.bf16.mxu0 %v3984_v2  ;;  %3344 = vmatprep.subr.bf16.mxu1 %v3741_v61 }
 0x5bf   :  { %3320 = vmatpush1.bf16.msra.mxu0 %v3995_v8  ;;  %3346 = vmatpush3.bf16.msra.mxu1 %v4015_v34 }
 0x5c0   :  { %3322 = vmatprep.subr.bf16.mxu0 %v3998_v13  ;;  %3347 = vmatprep.subr.bf16.mxu1 %v3741_v61 }
 0x5c3   :  { %3324 = vmatpush1.bf16.msra.mxu0 %v4007_v23  ;;  %3349 = vmatpush3.bf16.msra.mxu1 %v4025_v39 }
 0x5c4   :  { %3326 = vmatprep.subr.bf16.mxu0 %v4010_v29  ;;  %3350 = vmatprep.subr.bf16.mxu1 %v3741_v61 }
 0x5c7   :  { %3328 = vmatpush1.bf16.msra.mxu0 %v4019_v36  ;;  %3352 = vmatpush3.bf16.msra.mxu1 %v4038_v43 }
 0x5c8   :  { %3354 = vmatprep.subr.bf16.mxu0 %v3903_v59  ;;  %3385 = vmatprep.subr.bf16.mxu1 %v3741_v61 }
 0x67d   :  { %v1464_v52 = vpop.f32.mrb[6].mxu0  ;;  %v1535_v48 = vpop.f32.mrb[30].mxu1 }
 0x67e   :  { %v3566_v51 = vadd.f32 %v4099_v18, %v1464_v52  ;;  %v1466_v54 = vpop.f32.mrb[7].mxu0  ;;  %v2856_v56 = vpop.f32.mrb[31].mxu1  ;;  %v1536_v40 = vadd.f32 %v1535_v48, %v4105_v45 }
 0x67f   :  { %v3568_v38 = vadd.f32 %v4101_v25, %v1466_v54 }
 0x680   :  { %v2425_v58 = vmul.f32 -1.442695, %v3566_v51 }
 0x681   :  { %v2426_v4 = vmul.f32 -1.442695, %v3568_v38 }
 0x682   :  { %3662 = vpow2.f32 %v2425_v58 }
 0x683   :  { %3664 = vpow2.f32 %v2426_v4 }
 0x68c   :  { %v3663_v6 = vpop.eup %3662 }
 0x68d   :  { %v1543_v10 = vadd.f32 1.0, %v3663_v6  ;;  %v3665_v11 = vpop.eup %3664 }
 0x68e   :  { %v1550_v14 = vadd.f32 1.0, %v3665_v11 }
 0x68f   :  { %3666 = vrcp.f32 %v1543_v10 }
 0x690   :  { %3668 = vrcp.f32 %v1550_v14 }
 0x699   :  { %v3667_v30 = vpop.eup %3666 }
 0x69a   :  { %v1553_v46 = vmul.f32 %v3667_v30, %v1536_v40  ;;  %v3669_v5 = vpop.eup %3668 }
 0x69b   :  { %v1556_v20 = vsub.f32 1.0, %v3669_v5  ;;  %v1558_v33 = vmul.f32 %v3669_v5, %v4197_v26 }
 0x69c   :  { %v1554_v47 = vadd.f32 %v1553_v46, %v4084_v50 }
 0x69e   :  { %3670 = vtanh.f32 %v1554_v47 }
 0x6a8   :  { %v3671_v28 = vpop.eup %3670 }
 0x6a9   :  { %v1557_v32 = vmul.f32 %v3671_v28, %v1556_v20 }
 0x6ab   :  { %v4241_v37 = vadd.f32 %v1558_v33, %v1557_v32 }
 0x6ad   :  { %1631 = vmatmul.mubr.f32.vlgmr.msra.gmra.mrb[8].mxu0 %v4241_v37  ;;  %2890 = vmatmul.mubr.f32.vlgmr.msra.gmra.mrb[32].mxu1 %v4241_v37 }
 0x6ae   :  { %3356 = vmatpush1.bf16.msra.mxu0 %v3915_v9  ;;  %3387 = vmatpush3.bf16.msra.mxu1 %v3922_v24 }
 0x6af   :  { %3358 = vmatprep.subr.bf16.mxu0 %v3917_v12  ;;  %3388 = vmatprep.subr.bf16.mxu1 %v3741_v61 }
 0x6b0   :  { %1798 = vmatprep.mubr.f32.mxu0 %v3740_v60  ;;  %2924 = vmatprep.mubr.msk.f32.mxu1 %vm3742_vm2, %v3740_v60 }
 0x6b2   :  { %3360 = vmatpush1.bf16.msra.mxu0 %v3929_v27  ;;  %3390 = vmatpush3.bf16.msra.mxu1 %v3956_v35 }
 0x6b3   :  { %3362 = vmatprep.subr.bf16.mxu0 %v3933_v31  ;;  %3391 = vmatprep.subr.bf16.mxu1 %v3741_v61 }
 0x6b6   :  { %3364 = vmatpush1.bf16.msra.mxu0 %v3945_v42  ;;  %3393 = vmatpush3.bf16.msra.mxu1 %v3976_v62 }
 0x6b7   :  { %3366 = vmatprep.subr.bf16.mxu0 %v3949_v44  ;;  %3394 = vmatprep.subr.bf16.mxu1 %v3741_v61 }
 0x6ba   :  { %3368 = vmatpush1.bf16.msra.mxu0 %v3965_v49  ;;  %3396 = vmatpush3.bf16.msra.mxu1 %v3991_v7 }
 0x6bb   :  { %3370 = vmatprep.subr.bf16.mxu0 %v3970_v53  ;;  %3397 = vmatprep.subr.bf16.mxu1 %v3741_v61 }
 0x6be   :  { %3372 = vmatpush1.bf16.msra.mxu0 %v3980_v63  ;;  %3399 = vmatpush3.bf16.msra.mxu1 %v4003_v22 }
 0x6bf   :  { %3374 = vmatprep.subr.bf16.mxu0 %v3984_v2  ;;  %3400 = vmatprep.subr.bf16.mxu1 %v3741_v61 }
 0x6c2   :  { %3376 = vmatpush1.bf16.msra.mxu0 %v3995_v8  ;;  %3402 = vmatpush3.bf16.msra.mxu1 %v4015_v34 }
 0x6c3   :  { %3378 = vmatprep.subr.bf16.mxu0 %v3998_v13  ;;  %3403 = vmatprep.subr.bf16.mxu1 %v3741_v61 }
 0x6c6   :  { %3380 = vmatpush1.bf16.msra.mxu0 %v4007_v23  ;;  %3405 = vmatpush3.bf16.msra.mxu1 %v4025_v39 }
 0x6c7   :  { %3382 = vmatprep.subr.bf16.mxu0 %v4010_v29  ;;  %3406 = vmatprep.subr.bf16.mxu1 %v3741_v61 }
 0x6ca   :  { %3384 = vmatpush1.bf16.msra.mxu0 %v4019_v36  ;;  %3408 = vmatpush3.bf16.msra.mxu1 %v4038_v43 }
 0x6cb   :  { %3410 = vmatprep.subr.bf16.mxu0 %v3903_v59  ;;  %3441 = vmatprep.subr.bf16.mxu1 %v3741_v61 }
 0x780   :  { %v1632_v50 = vpop.f32.mrb[8].mxu0  ;;  %v1703_v16 = vpop.f32.mrb[32].mxu1 }
 0x781   :  { %v3570_v41 = vadd.f32 %v4099_v18, %v1632_v50  ;;  %v1634_v15 = vpop.f32.mrb[9].mxu0  ;;  %v2891_v21 = vpop.f32.mrb[33].mxu1  ;;  %v1704_v38 = vadd.f32 %v1703_v16, %v4105_v45 }
 0x782   :  { %v3572_v52 = vadd.f32 %v4101_v25, %v1634_v15 }
 0x783   :  { %v2427_v19 = vmul.f32 -1.442695, %v3570_v41 }
 0x784   :  { %v2428_v48 = vmul.f32 -1.442695, %v3572_v52 }
 0x785   :  { %3672 = vpow2.f32 %v2427_v19 }
 0x786   :  { %3674 = vpow2.f32 %v2428_v48 }
 0x78f   :  { %v3673_v51 = vpop.eup %3672 }
 0x790   :  { %v1711_v54 = vadd.f32 1.0, %v3673_v51  ;;  %v3675_v56 = vpop.eup %3674 }
 0x791   :  { %v1718_v58 = vadd.f32 1.0, %v3675_v56 }
 0x792   :  { %3676 = vrcp.f32 %v1711_v54 }
 0x793   :  { %3678 = vrcp.f32 %v1718_v58 }
 0x79c   :  { %v3677_v4 = vpop.eup %3676 }
 0x79d   :  { %v1721_v6 = vmul.f32 %v3677_v4, %v1704_v38  ;;  %v3679_v11 = vpop.eup %3678 }
 0x79e   :  { %v1724_v14 = vsub.f32 1.0, %v3679_v11  ;;  %v1726_v46 = vmul.f32 %v3679_v11, %v4241_v37 }
 0x79f   :  { %v1722_v10 = vadd.f32 %v1721_v6, %v4090_v57 }
 0x7a1   :  { %3680 = vtanh.f32 %v1722_v10 }
 0x7ab   :  { %v3681_v40 = vpop.eup %3680 }
 0x7ac   :  { %v1725_v30 = vmul.f32 %v3681_v40, %v1724_v14  ;;  %v2246_v14 = vld [vmem:[#allocation4 + $0x330] sm:$0xff]  ;;  %v2247_v40 = vld [vmem:[#allocation4 + $0x348] sm:$0xff] }
 0x7ae   :  { %v4285_v47 = vadd.f32 %v1726_v46, %v1725_v30  ;;  %v2248_v30 = vld [vmem:[#allocation4 + $0x360] sm:$0xff]  ;;  %v2249_v46 = vld [vmem:[#allocation4 + $0x378] sm:$0xff] }
 0x7b0   :  { %1799 = vmatmul.mubr.f32.vlgmr.msra.gmra.mrb[10].mxu0 %v4285_v47  ;;  %2925 = vmatmul.mubr.f32.vlgmr.msra.gmra.mrb[34].mxu1 %v4285_v47 }
 0x7b1   :  { %3412 = vmatpush1.bf16.msra.mxu0 %v3915_v9  ;;  %3443 = vmatpush3.bf16.msra.mxu1 %v3922_v24 }
 0x7b2   :  { %3414 = vmatprep.subr.bf16.mxu0 %v3917_v12  ;;  %3444 = vmatprep.subr.bf16.mxu1 %v3741_v61 }
 0x7b3   :  { %1966 = vmatprep.mubr.f32.mxu0 %v3740_v60  ;;  %2959 = vmatprep.mubr.msk.f32.mxu1 %vm3742_vm2, %v3740_v60 }
 0x7b5   :  { %3416 = vmatpush1.bf16.msra.mxu0 %v3929_v27  ;;  %3446 = vmatpush3.bf16.msra.mxu1 %v3956_v35 }
 0x7b6   :  { %3418 = vmatprep.subr.bf16.mxu0 %v3933_v31  ;;  %3447 = vmatprep.subr.bf16.mxu1 %v3741_v61 }
 0x7b9   :  { %3420 = vmatpush1.bf16.msra.mxu0 %v3945_v42  ;;  %3449 = vmatpush3.bf16.msra.mxu1 %v3976_v62 }
 0x7ba   :  { %3422 = vmatprep.subr.bf16.mxu0 %v3949_v44  ;;  %3450 = vmatprep.subr.bf16.mxu1 %v3741_v61 }
 0x7bd   :  { %3424 = vmatpush1.bf16.msra.mxu0 %v3965_v49  ;;  %3452 = vmatpush3.bf16.msra.mxu1 %v3991_v7 }
 0x7be   :  { %3426 = vmatprep.subr.bf16.mxu0 %v3970_v53  ;;  %3453 = vmatprep.subr.bf16.mxu1 %v3741_v61 }
 0x7c1   :  { %3428 = vmatpush1.bf16.msra.mxu0 %v3980_v63  ;;  %3455 = vmatpush3.bf16.msra.mxu1 %v4003_v22 }
 0x7c2   :  { %3430 = vmatprep.subr.bf16.mxu0 %v3984_v2  ;;  %3456 = vmatprep.subr.bf16.mxu1 %v3741_v61 }
 0x7c5   :  { %3432 = vmatpush1.bf16.msra.mxu0 %v3995_v8  ;;  %3458 = vmatpush3.bf16.msra.mxu1 %v4015_v34 }
 0x7c6   :  { %3434 = vmatprep.subr.bf16.mxu0 %v3998_v13  ;;  %3459 = vmatprep.subr.bf16.mxu1 %v3741_v61 }
 0x7c9   :  { %3436 = vmatpush1.bf16.msra.mxu0 %v4007_v23  ;;  %3461 = vmatpush3.bf16.msra.mxu1 %v4025_v39 }
 0x7ca   :  { %3438 = vmatprep.subr.bf16.mxu0 %v4010_v29  ;;  %3462 = vmatprep.subr.bf16.mxu1 %v3741_v61 }
 0x7cd   :  { %3440 = vmatpush1.bf16.msra.mxu0 %v4019_v36  ;;  %3464 = vmatpush3.bf16.msra.mxu1 %v4038_v43 }
 0x7ce   :  { %3466 = vmatprep.subr.bf16.mxu0 %v3903_v59  ;;  %3497 = vmatprep.subr.bf16.mxu1 %v3741_v61 }
 0x883   :  { %v1800_v57 = vpop.f32.mrb[10].mxu0  ;;  %v1871_v5 = vpop.f32.mrb[34].mxu1 }
 0x884   :  { %v3574_v20 = vadd.f32 %v4099_v18, %v1800_v57  ;;  %v1802_v28 = vpop.f32.mrb[11].mxu0  ;;  %v2926_v32 = vpop.f32.mrb[35].mxu1  ;;  %v1872_v59 = vadd.f32 %v1871_v5, %v4105_v45  ;;  %v3533_v57 = vpack.c.bf16 %v2249_v46, %v2248_v30  ;;  %v2250_v5 = vld [vmem:[#allocation4 + $0x390] sm:$0xff] }
 0x885   :  { %v3576_v50 = vadd.f32 %v4101_v25, %v1802_v28  ;;  %v2252_v32 = vld [vmem:[#allocation4 + $0x3c0] sm:$0xff] }
 0x886   :  { %v2429_v33 = vmul.f32 -1.442695, %v3574_v20  ;;  %v2251_v20 = vld [vmem:[#allocation4 + $0x3a8] sm:$0xff] }
 0x887   :  { %v2430_v16 = vmul.f32 -1.442695, %v3576_v50  ;;  %v3537_v28 = vpack.c.bf16 %v2251_v20, %v2250_v5 }
 0x888   :  { %3682 = vpow2.f32 %v2429_v33  ;;  %v2253_v33 = vld [vmem:[#allocation4 + $0x3d8] sm:$0xff] }
 0x889   :  { %3684 = vpow2.f32 %v2430_v16  ;;  %v3541_v50 = vpack.c.bf16 %v2253_v33, %v2252_v32  ;;  %v2254_v16 = vld [vmem:[#allocation4 + $0x3f0] sm:$0xff] }
 0x892   :  { %v3683_v41 = vpop.eup %3682 }
 0x893   :  { %v1879_v15 = vadd.f32 1.0, %v3683_v41  ;;  %v3685_v21 = vpop.eup %3684  ;;  %v2255_v41 = vld [vmem:[#allocation4 + $0x408] sm:$0xff] }
 0x894   :  { %v1886_v19 = vadd.f32 1.0, %v3685_v21  ;;  %v2257_v21 = vld [vmem:[#allocation4 + $0x438] sm:$0xff] }
 0x895   :  { %3686 = vrcp.f32 %v1879_v15  ;;  %v2256_v15 = vld [vmem:[#allocation4 + $0x420] sm:$0xff] }
 0x896   :  { %3688 = vrcp.f32 %v1886_v19  ;;  %v3549_v19 = vpack.c.bf16 %v2257_v21, %v2256_v15 }
 0x89f   :  { %v3687_v52 = vpop.eup %3686 }
 0x8a0   :  { %v1889_v48 = vmul.f32 %v3687_v52, %v1872_v59  ;;  %v3689_v54 = vpop.eup %3688 }
 0x8a1   :  { %v1892_v56 = vsub.f32 1.0, %v3689_v54  ;;  %v1894_v4 = vmul.f32 %v3689_v54, %v4285_v47 }
 0x8a2   :  { %v1890_v51 = vadd.f32 %v1889_v48, %v4088_v55 }
 0x8a4   :  { %3690 = vtanh.f32 %v1890_v51 }
 0x8ae   :  { %v3691_v58 = vpop.eup %3690 }
 0x8af   :  { %v1893_v38 = vmul.f32 %v3691_v58, %v1892_v56 }
 0x8b1   :  { %v4329_v6 = vadd.f32 %v1894_v4, %v1893_v38 }
 0x8b3   :  { %1967 = vmatmul.mubr.f32.vlgmr.msra.gmra.mrb[12].mxu0 %v4329_v6  ;;  %2960 = vmatmul.mubr.f32.vlgmr.msra.gmra.mrb[36].mxu1 %v4329_v6 }
 0x8b4   :  { %3468 = vmatpush1.bf16.msra.mxu0 %v3915_v9  ;;  %3499 = vmatpush3.bf16.msra.mxu1 %v3922_v24  ;;  %v2243_v9 = vld [vmem:[#allocation4 + $0x2e8] sm:$0xff] }
 0x8b5   :  { %3470 = vmatprep.subr.bf16.mxu0 %v3917_v12  ;;  %3500 = vmatprep.subr.bf16.mxu1 %v3741_v61 }
 0x8b6   :  { %2134 = vmatprep.mubr.f32.mxu0 %v3740_v60  ;;  %2994 = vmatprep.mubr.msk.f32.mxu1 %vm3742_vm2, %v3740_v60  ;;  %v2242_v60 = vld [vmem:[#allocation4 + $0x2d0] sm:$0xff] }
 0x8b7   :  { %v3521_v12 = vpack.c.bf16 %v2243_v9, %v2242_v60 }
 0x8b8   :  { %3472 = vmatpush1.bf16.msra.mxu0 %v3929_v27  ;;  %3502 = vmatpush3.bf16.msra.mxu1 %v3956_v35 }
 0x8b9   :  { %3474 = vmatprep.subr.bf16.mxu0 %v3933_v31  ;;  %3503 = vmatprep.subr.bf16.mxu1 %v3741_v61 }
 0x8bc   :  { %3476 = vmatpush1.bf16.msra.mxu0 %v3945_v42  ;;  %3505 = vmatpush3.bf16.msra.mxu1 %v3976_v62 }
 0x8bd   :  { %3478 = vmatprep.subr.bf16.mxu0 %v3949_v44  ;;  %3506 = vmatprep.subr.bf16.mxu1 %v3741_v61 }
 0x8c0   :  { %3480 = vmatpush1.bf16.msra.mxu0 %v3965_v49  ;;  %3508 = vmatpush3.bf16.msra.mxu1 %v3991_v7 }
 0x8c1   :  { %3482 = vmatprep.subr.bf16.mxu0 %v3970_v53  ;;  %3509 = vmatprep.subr.bf16.mxu1 %v3741_v61 }
 0x8c4   :  { %3484 = vmatpush1.bf16.msra.mxu0 %v3980_v63  ;;  %3511 = vmatpush3.bf16.msra.mxu1 %v4003_v22 }
 0x8c5   :  { %3486 = vmatprep.subr.bf16.mxu0 %v3984_v2  ;;  %3512 = vmatprep.subr.bf16.mxu1 %v3741_v61 }
 0x8c8   :  { %3488 = vmatpush1.bf16.msra.mxu0 %v3995_v8  ;;  %3514 = vmatpush3.bf16.msra.mxu1 %v4015_v34 }
 0x8c9   :  { %3490 = vmatprep.subr.bf16.mxu0 %v3998_v13  ;;  %3515 = vmatprep.subr.bf16.mxu1 %v3741_v61 }
 0x8cc   :  { %3492 = vmatpush1.bf16.msra.mxu0 %v4007_v23  ;;  %3517 = vmatpush3.bf16.msra.mxu1 %v4025_v39  ;;  %v2245_v39 = vld [vmem:[#allocation4 + $0x318] sm:$0xff] }
 0x8cd   :  { %3494 = vmatprep.subr.bf16.mxu0 %v4010_v29  ;;  %3518 = vmatprep.subr.bf16.mxu1 %v3741_v61 }
 0x8d0   :  { %3496 = vmatpush1.bf16.msra.mxu0 %v4019_v36  ;;  %3520 = vmatpush3.bf16.msra.mxu1 %v4038_v43  ;;  %v2244_v36 = vld [vmem:[#allocation4 + $0x300] sm:$0xff] }
 0x8d1   :  { %3522 = vmatprep.subr.bf16.mxu0 %v3521_v12  ;;  %v3525_v11 = vpack.c.bf16 %v2245_v39, %v2244_v36 }
 0x986   :  { %v1968_v24 = vpop.f32.mrb[12].mxu0  ;;  %v2039_v27 = vpop.f32.mrb[36].mxu1 }
 0x987   :  { %v3578_v31 = vadd.f32 %v4099_v18, %v1968_v24  ;;  %v1970_v42 = vpop.f32.mrb[13].mxu0  ;;  %v2961_v44 = vpop.f32.mrb[37].mxu1  ;;  %v2040_v7 = vadd.f32 %v2039_v27, %v4105_v45 }
 0x988   :  { %v3580_v49 = vadd.f32 %v4101_v25, %v1970_v42 }
 0x989   :  { %v2431_v35 = vmul.f32 -1.442695, %v3578_v31 }
 0x98a   :  { %v2432_v53 = vmul.f32 -1.442695, %v3580_v49 }
 0x98b   :  { %3692 = vpow2.f32 %v2431_v35 }
 0x98c   :  { %3694 = vpow2.f32 %v2432_v53 }
 0x995   :  { %v3693_v61 = vpop.eup %3692 }
 0x996   :  { %v2047_v62 = vadd.f32 1.0, %v3693_v61  ;;  %v3695_v63 = vpop.eup %3694 }
 0x997   :  { %v2054_v2 = vadd.f32 1.0, %v3695_v63 }
 0x998   :  { %3696 = vrcp.f32 %v2047_v62 }
 0x999   :  { %3698 = vrcp.f32 %v2054_v2 }
 0x9a2   :  { %v3697_v8 = vpop.eup %3696 }
 0x9a3   :  { %v2057_v13 = vmul.f32 %v3697_v8, %v2040_v7  ;;  %v3699_v23 = vpop.eup %3698 }
 0x9a4   :  { %v2060_v29 = vsub.f32 1.0, %v3699_v23  ;;  %v2062_v55 = vmul.f32 %v3699_v23, %v4329_v6 }
 0x9a5   :  { %v2058_v22 = vadd.f32 %v2057_v13, %v4094_v3  ;;  %v3529_v3 = vpack.c.bf16 %v2247_v40, %v2246_v14 }
 0x9a7   :  { %3700 = vtanh.f32 %v2058_v22 }
 0x9b1   :  { %v3701_v34 = vpop.eup %3700 }
 0x9b2   :  { %v2061_v43 = vmul.f32 %v3701_v34, %v2060_v29 }
 0x9b4   :  { %v4371_v10 = vadd.f32 %v2062_v55, %v2061_v43 }
 0x9b6   :  { %2135 = vmatmul.mubr.f32.vlgmr.msra.gmra.mrb[14].mxu0 %v4371_v10  ;;  %2995 = vmatmul.mubr.f32.vlgmr.msra.gmra.mrb[38].mxu1 %v4371_v10 }
 0x9b7   :  { %3524 = vmatpush3.bf16.msra.mxu0 %v3521_v12  ;;  %3029 = vmatprep.mubr.f32.mxu0 %v4109_v17  ;;  %v3545_v17 = vpack.c.bf16 %v2255_v41, %v2254_v16 }
 0x9b8   :  { %3526 = vmatprep.subr.bf16.mxu0 %v3525_v11 }
 0x9bb   :  { %3528 = vmatpush3.bf16.msra.mxu0 %v3525_v11 }
 0x9bc   :  { %3530 = vmatprep.subr.bf16.mxu0 %v3529_v3 }
 0x9bf   :  { %3532 = vmatpush3.bf16.msra.mxu0 %v3529_v3 }
 0x9c0   :  { %3534 = vmatprep.subr.bf16.mxu0 %v3533_v57 }
 0x9c3   :  { %3536 = vmatpush3.bf16.msra.mxu0 %v3533_v57 }
 0x9c4   :  { %3538 = vmatprep.subr.bf16.mxu0 %v3537_v28 }
 0x9c7   :  { %3540 = vmatpush3.bf16.msra.mxu0 %v3537_v28 }
 0x9c8   :  { %3542 = vmatprep.subr.bf16.mxu0 %v3541_v50 }
 0x9cb   :  { %3544 = vmatpush3.bf16.msra.mxu0 %v3541_v50 }
 0x9cc   :  { %3546 = vmatprep.subr.bf16.mxu0 %v3545_v17 }
 0x9cf   :  { %3548 = vmatpush3.bf16.msra.mxu0 %v3545_v17 }
 0x9d0   :  { %3550 = vmatprep.subr.bf16.mxu0 %v3549_v19 }
 0x9d3   :  { %3552 = vmatpush3.bf16.msra.mxu0 %v3549_v19 }
 0x9d6   :  { %3030 = vmatmul.mubr.f32.vlgmr.msra.gmra.mrb[16].mxu0 %v4153_v1 }
 0x9d7   :  { %3032 = vmatprep.mubr.f32.mxu0 %v4197_v26 }
 0x9da   :  { %3033 = vmatmul.mubr.f32.gmra.mrb[18].mxu0 %v4241_v37 }
 0x9db   :  { %3035 = vmatprep.mubr.f32.mxu0 %v4285_v47 }
 0x9de   :  { %3036 = vmatmul.mubr.f32.gmra.mrb[20].mxu0 %v4329_v6 }
 0x9df   :  { %3038 = vmatprep.mubr.f32.mxu0 %v4371_v10 }
 0xa89   :  { %v2136_v59 = vpop.f32.mrb[14].mxu0  ;;  %v2207_v52 = vpop.f32.mrb[38].mxu1 }
 0xa8a   :  { %v3582_v48 = vadd.f32 %v4099_v18, %v2136_v59  ;;  %v2138_v51 = vpop.f32.mrb[15].mxu0  ;;  %v2996_v54 = vpop.f32.mrb[39].mxu1  ;;  %v2208_v4 = vadd.f32 %v2207_v52, %v4105_v45  ;;  %v2258_v18 = vld [vmem:[%s4417_s3 + $0x4] ss:$0 sm:$0xff] }
 0xa8b   :  { %v3584_v58 = vadd.f32 %v4101_v25, %v2138_v51 }
 0xa8c   :  { %v2433_v56 = vmul.f32 -1.442695, %v3582_v48 }
 0xa8d   :  { %v2434_v1 = vmul.f32 -1.442695, %v3584_v58 }
 0xa8e   :  { %3702 = vpow2.f32 %v2433_v56 }
 0xa8f   :  { %3704 = vpow2.f32 %v2434_v1 }
 0xa98   :  { %v3703_v26 = vpop.eup %3702 }
 0xa99   :  { %v2215_v37 = vadd.f32 1.0, %v3703_v26  ;;  %v3705_v47 = vpop.eup %3704 }
 0xa9a   :  { %v2222_v38 = vadd.f32 1.0, %v3705_v47 }
 0xa9b   :  { %3706 = vrcp.f32 %v2215_v37 }
 0xa9c   :  { %3708 = vrcp.f32 %v2222_v38 }
 0xaa5   :  { %v3707_v6 = vpop.eup %3706 }
 0xaa6   :  { %v2225_v60 = vmul.f32 %v3707_v6, %v2208_v4  ;;  %v3709_v35 = vpop.eup %3708 }
 0xaa7   :  { %v2228_v62 = vsub.f32 1.0, %v3709_v35  ;;  %v2230_v7 = vmul.f32 %v3709_v35, %v4371_v10 }
 0xaa8   :  { %v2226_v9 = vadd.f32 %v2225_v60, %v4092_v0 }
 0xaa9   :  { %v3031_v25 = vpop.f32.mrb[16].mxu0 }
 0xaaa   :  { %3710 = vtanh.f32 %v2226_v9  ;;  %v2331_v12 = vadd.f32 %v3031_v25, %v2258_v18  ;;  %v2325_v24 = vpop.f32.mrb[17].mxu0 }
 0xaab   :  { %v2326_v27 = vadd.f32 %v2325_v24, %v2258_v18 }
 0xaac   :  { %2365 = vst [vmem:[%s4418_s4 + $0x8] sm:$0xff] %v2331_v12 }
 0xaad   :  { %2364 = vst [vmem:[%s4418_s4] sm:$0xff] %v2326_v27  ;;  %v3034_v45 = vpop.f32.mrb[18].mxu0 }
 0xaae   :  { %v2341_v31 = vadd.f32 %v3034_v45, %v2258_v18  ;;  %v2335_v42 = vpop.f32.mrb[19].mxu0 }
 0xaaf   :  { %v2336_v44 = vadd.f32 %v2335_v42, %v2258_v18 }
 0xab0   :  { %2367 = vst [vmem:[%s4418_s4 + $0x18] sm:$0xff] %v2341_v31 }
 0xab1   :  { %2366 = vst [vmem:[%s4418_s4 + $0x10] sm:$0xff] %v2336_v44  ;;  %v3037_v0 = vpop.f32.mrb[20].mxu0 }
 0xab2   :  { %v2351_v49 = vadd.f32 %v3037_v0, %v2258_v18  ;;  %v2345_v53 = vpop.f32.mrb[21].mxu0 }
 0xab3   :  { %v2346_v61 = vadd.f32 %v2345_v53, %v2258_v18 }
 0xab4   :  { %v3711_v63 = vpop.eup %3710  ;;  %2369 = vst [vmem:[%s4418_s4 + $0x28] sm:$0xff] %v2351_v49 }
 0xab5   :  { %2368 = vst [vmem:[%s4418_s4 + $0x20] sm:$0xff] %v2346_v61  ;;  %v2229_v2 = vmul.f32 %v3711_v63, %v2228_v62 }
 0xab7   :  { %v2231_v8 = vadd.f32 %v2230_v7, %v2229_v2 }
 0xab9   :  { %3039 = vmatmul.mubr.f32.gmra.mrb[22].mxu0 %v2231_v8 }
 0xb8c   :  { %v3040_v13 = vpop.f32.mrb[22].mxu0 }
 0xb8d   :  { %v2361_v22 = vadd.f32 %v3040_v13, %v2258_v18  ;;  %v2355_v23 = vpop.f32.mrb[23].mxu0 }
 0xb8e   :  { %v2356_v29 = vadd.f32 %v2355_v23, %v2258_v18 }
 0xb8f   :  { %2371 = vst [vmem:[%s4418_s4 + $0x38] sm:$0xff] %v2361_v22 }
 0xb90   :  { %2370 = vst [vmem:[%s4418_s4 + $0x30] sm:$0xff] %v2356_v29 }
 0xb91   :  { %2376 = vsyncpa [#allocation5], 1 }

</bundles_post_ra>
